<compile_context>
chip_gen: v5e
topology: v5e:2x2
jax: 0.10.0
libtpu: 0.0.40
codegen_flags: <defaults>
</compile_context>

<pallas_src>
import math
from functools import partial

import jax
import jax.numpy as jnp
from jax import lax
from jax.experimental import pallas as pl
from jax.experimental.pallas import tpu as pltpu


_NN = (((1,), (0,)), ((), ()))   # ordinary  A @ B        (contract lhs[1], rhs[0])
_NT = (((1,), (1,)), ((), ()))   # A @ B.T                 (contract lhs[1], rhs[1])


# ----------------------------------------------------------------------------
# Fused forward kernel: one grid step == one batch element, everything resident
# ----------------------------------------------------------------------------

def _fused_forward_kernel(
    # ---- inputs (batch dim squeezed by BlockSpec)
    h0_ref,          # (S, D)        embedding output == hidden_states[0], f32
    mask_ref,        # (1, S)        float attention mask
    wqkv_ref,        # (L, D, 3D)    fused Q|K|V projection, bf16
    wo_ref,          # (L, D, D)     bf16
    w1_ref,          # (L, D, H)     bf16
    b1_ref,          # (L, 1, H)     f32
    w2_ref,          # (L, H, D)     bf16
    b2_ref,          # (L, 1, D)     f32
    lm_w_ref,        # (D, V)        bf16
    lm_b_ref,        # (1, V)        f32
    sae_we_ref,      # (nS*D, nS*F)  block-diagonal stacked encoders, bf16
    sae_be_ref,      # (1, nS*F)     f32
    sae_wd_ref,      # (nS*F, nS*D)  block-diagonal stacked decoders, bf16
    sae_bd_ref,      # (1, nS*D)     f32
    # ---- outputs (batch dim squeezed)
    logits_ref,        # (S, V)
    h_out_ref,         # (L, S, D)
    attn_ref,          # (L, S, S)
    pooled_recon_ref,  # (1, 2*nS*D)   [pooled_all | recon_all]
    feats_ref,         # (1, nS*F)
    *, n_layers, sae_layer_indices, D,
):
    f32 = jnp.float32
    bf16 = jnp.bfloat16

    h = h0_ref[...]                         # (S, D) f32
    mask = mask_ref[...]                    # (1, S) f32

    # hoisted once-per-step quantities (all f32)
    scale = 1.0 / math.sqrt(D)
    attn_bias = (mask - 1.0) * 1e9          # additive key-padding mask, (1, S)
    den = jnp.sum(mask, axis=-1, keepdims=True)       # (1, 1)
    inv_den = 1.0 / den                     # exact divide: approx buys nothing here
    # TODO(synk): all-zero mask rows give 1/0 -> inf/NaN, same hazard as the
    # PyTorch reference's masked mean.

    # incremental masked-sum pooling: only SAE-tapped hidden states are pooled,
    # and no list of full per-layer activations is kept alive.
    pooled = []
    if 0 in sae_layer_indices:
        pooled.append(lax.dot_general(mask, h, _NN, preferred_element_type=f32))

    for l in range(n_layers):               # static unroll: n_layers tiny & known
        # fused QKV: one bf16 MXU matmul, f32 accumulation
        qkv = lax.dot_general(h.astype(bf16), wqkv_ref[l], _NN,
                              preferred_element_type=f32)
        q = qkv[:, 0 * D:1 * D].astype(bf16)
        k = qkv[:, 1 * D:2 * D].astype(bf16)
        v = qkv[:, 2 * D:3 * D].astype(bf16)

        # softmax math stays in f32 (bias / max-sub / exp); approx recip on EUP
        scores = lax.dot_general(q, k, _NT, preferred_element_type=f32) * scale
        scores = scores + attn_bias
        scores = scores - jnp.max(scores, axis=-1, keepdims=True)
        e = jnp.exp(scores)
        attn = e * pl.reciprocal(jnp.sum(e, axis=-1, keepdims=True), approx=True)
        attn_ref[l] = attn                  # per-layer direct store (no epilogue concat)

        ctx = lax.dot_general(attn.astype(bf16), v, _NN, preferred_element_type=f32)
        h = h + lax.dot_general(ctx.astype(bf16), wo_ref[l], _NN,
                                preferred_element_type=f32)

        mlp = jnp.maximum(
            lax.dot_general(h.astype(bf16), w1_ref[l], _NN,
                            preferred_element_type=f32) + b1_ref[l], 0.0)
        h = (h + lax.dot_general(mlp.astype(bf16), w2_ref[l], _NN,
                                 preferred_element_type=f32) + b2_ref[l])

        h_out_ref[l] = h                    # per-layer direct store
        if (l + 1) in sae_layer_indices:
            pooled.append(lax.dot_general(mask, h, _NN, preferred_element_type=f32))

    # ---- LM head
    logits_ref[...] = (lax.dot_general(h.astype(bf16), lm_w_ref[...], _NN,
                                       preferred_element_type=f32) + lm_b_ref[...])

    # ---- masked mean + stacked block-diagonal SAEs
    #      (one encoder matmul + one decoder matmul covers all SAEs; fine at n_sae=2)
    x_cat = jnp.concatenate(pooled, axis=-1) * inv_den             # (1, nS*D)
    feats = jnp.maximum(
        lax.dot_general(x_cat.astype(bf16), sae_we_ref[...], _NN,
                        preferred_element_type=f32) + sae_be_ref[...], 0.0)
    recon = (lax.dot_general(feats.astype(bf16), sae_wd_ref[...], _NN,
                             preferred_element_type=f32) + sae_bd_ref[...])
    feats_ref[...] = feats
    pooled_recon_ref[...] = jnp.concatenate([x_cat, recon], axis=-1)


# ----------------------------------------------------------------------------
# Parameter packing (done once, outside the forward hot path)
# ----------------------------------------------------------------------------

def pack_replacement_model(params, sae_models):
    f32, bf16 = jnp.float32, jnp.bfloat16
    D = params['embed'].shape[1]
    V = params['lm_w'].shape[1]
    L = len(params['layers'])
    H = params['layers'][0]['w1'].shape[1]
    F = next(iter(sae_models.values()))['w_enc'].shape[1]
    # same condition as the PyTorch loop: layer_idx < len(hidden_states) == L + 1
    sae_layer_indices = tuple(sorted(k for k in sae_models if k < L + 1))
    n_sae = len(sae_layer_indices)

    # MXU operand weights pre-cast to bf16; biases stay f32 (added after f32 acc)
    wqkv = jnp.stack([jnp.concatenate([p['wq'], p['wk'], p['wv']], axis=1)
                      for p in params['layers']]).astype(bf16)     # (L, D, 3D)
    wo = jnp.stack([p['wo'] for p in params['layers']]).astype(bf16)
    w1 = jnp.stack([p['w1'] for p in params['layers']]).astype(bf16)
    b1 = jnp.stack([p['b1'] for p in params['layers']]).astype(f32)
    w2 = jnp.stack([p['w2'] for p in params['layers']]).astype(bf16)
    b2 = jnp.stack([p['b2'] for p in params['layers']]).astype(f32)

    # block-diagonal stacked SAEs (single enc / dec matmul in the kernel)
    we_bd = jnp.zeros((n_sae * D, n_sae * F), f32)
    wd_bd = jnp.zeros((n_sae * F, n_sae * D), f32)
    be, bd = [], []
    for i, idx in enumerate(sae_layer_indices):
        sp = sae_models[idx]
        we_bd = we_bd.at[i * D:(i + 1) * D, i * F:(i + 1) * F].set(sp['w_enc'])
        wd_bd = wd_bd.at[i * F:(i + 1) * F, i * D:(i + 1) * D].set(sp['w_dec'])
        be.append(sp['b_enc'])
        bd.append(sp['b_dec'])
    be_cat = jnp.concatenate(be, axis=1).astype(f32)       # (1, n_sae*F)
    bd_cat = jnp.concatenate(bd, axis=1).astype(f32)       # (1, n_sae*D)

    return {
        'embed': params['embed'].astype(f32),
        'arrays': (wqkv, wo, w1, b1, w2, b2,
                   params['lm_w'].astype(bf16), params['lm_b'].astype(f32),
                   we_bd.astype(bf16), be_cat, wd_bd.astype(bf16), bd_cat),
        'meta': dict(L=L, D=D, V=V, F=F, H=H, n_sae=n_sae,
                     sae_layer_indices=sae_layer_indices),
    }


# ----------------------------------------------------------------------------
# ReplacementModel forward: one fused pallas_call on a parallel batch grid
# ----------------------------------------------------------------------------

def _const_index_map(ndim):
    zeros = (0,) * ndim
    return lambda b: zeros


def replacement_model_forward(input_ids, attention_mask, packed,
                              return_features=True):
    meta = packed['meta']
    L, D, V, F, H = meta['L'], meta['D'], meta['V'], meta['F'], meta['H']
    sae_idx = meta['sae_layer_indices']
    n_sae = meta['n_sae']
    B, S = input_ids.shape

    # embedding lookup (gather) is XLA glue, not a Pallas hot path
    h0 = jnp.take(packed['embed'], input_ids, axis=0)            # (B, S, D) f32
    mask3 = attention_mask.astype(jnp.float32).reshape(B, 1, S)  # (B, 1, S)

    arrays = packed['arrays']
    kernel = partial(_fused_forward_kernel, n_layers=L,
                     sae_layer_indices=sae_idx, D=D)

    # batch-squeezed activation blocks; grid-invariant full-array weight blocks
    in_specs = [
        pl.BlockSpec((None, S, D), lambda b: (b, 0, 0)),      # h0
        pl.BlockSpec((None, 1, S), lambda b: (b, 0, 0)),      # mask
    ] + [pl.BlockSpec(a.shape, _const_index_map(a.ndim)) for a in arrays]

    out_shape = (
        jax.ShapeDtypeStruct((B, S, V), jnp.float32),               # logits
        jax.ShapeDtypeStruct((B, L, S, D), jnp.float32),            # hidden states 1..L
        jax.ShapeDtypeStruct((B, L, S, S), jnp.float32),            # attentions
        jax.ShapeDtypeStruct((B, 1, 2 * n_sae * D), jnp.float32),   # [pooled | recon]
        jax.ShapeDtypeStruct((B, 1, n_sae * F), jnp.float32),       # features
    )
    out_specs = (
        pl.BlockSpec((None, S, V), lambda b: (b, 0, 0)),
        pl.BlockSpec((None, L, S, D), lambda b: (b, 0, 0, 0)),
        pl.BlockSpec((None, L, S, S), lambda b: (b, 0, 0, 0)),
        pl.BlockSpec((None, 1, 2 * n_sae * D), lambda b: (b, 0, 0)),
        pl.BlockSpec((None, 1, n_sae * F), lambda b: (b, 0, 0)),
    )

    # advisory cost estimate so XLA can schedule surrounding glue sensibly
    matmul_flops = (
        L * (2 * S * D * 3 * D + 2 * S * S * D + 2 * S * S * D
             + 2 * S * D * D + 2 * S * D * H + 2 * S * H * D)
        + 2 * S * D * V
        + 2 * (n_sae * D) * (n_sae * F) + 2 * (n_sae * F) * (n_sae * D)
        + n_sae * 2 * S * D)
    in_bytes = int(h0.size * 4 + mask3.size * 4
                   + sum(int(a.size) * a.dtype.itemsize for a in arrays))
    out_bytes = int(sum(math.prod(s.shape) * 4 for s in out_shape))
    cost = pl.CostEstimate(flops=int(B * matmul_flops),
                           transcendentals=int(B * (L * S * S + L * S + 4)),
                           bytes_accessed=in_bytes + out_bytes)

    logits, h_all, attn_all, pooled_recon, feats_cat = pl.pallas_call(
        kernel,
        grid=(B,),
        in_specs=in_specs,
        out_specs=out_specs,
        out_shape=out_shape,
        compiler_params=pltpu.CompilerParams(
            dimension_semantics=("parallel",)),   # batch -> second TensorCore on v7x
        cost_estimate=cost,
    )(h0, mask3, *arrays)

    # HF-like structure (cheap XLA slices, no reshapes of kernel data needed)
    hidden_states = (h0,) + tuple(h_all[:, l] for l in range(L))
    attentions = tuple(attn_all[:, l][:, None] for l in range(L))   # (B, 1, S, S)

    results = {'logits': logits,
               'hidden_states': hidden_states,
               'attentions': attentions}

    if return_features:
        pooled_recon2 = pooled_recon[:, 0]       # (B, 2*n_sae*D)
        feats2 = feats_cat[:, 0]                 # (B, n_sae*F)
        layer_features = {}
        for i, idx in enumerate(sae_idx):
            layer_features[idx] = {
                'features': feats2[:, i * F:(i + 1) * F],
                'reconstructed': pooled_recon2[:, n_sae * D + i * D:
                                               n_sae * D + (i + 1) * D],
                'original': pooled_recon2[:, i * D:(i + 1) * D],
            }
        results['layer_features'] = layer_features
    return results


# ----------------------------------------------------------------------------
# Deterministic parameter construction
# ----------------------------------------------------------------------------

def init_params(key, vocab=16, D=32, H=64, F=64, n_layers=2):
    keys = jax.random.split(key, 4 + n_layers)
    params = {
        'embed': 0.02 * jax.random.normal(keys[0], (vocab, D), jnp.float32),
        'lm_w': 0.02 * jax.random.normal(keys[1], (D, vocab), jnp.float32),
        'lm_b': jnp.zeros((1, vocab), jnp.float32),
        'layers': [],
    }
    for li in range(n_layers):
        k = jax.random.split(keys[2 + li], 6)
        params['layers'].append({
            'wq': 0.05 * jax.random.normal(k[0], (D, D), jnp.float32),
            'wk': 0.05 * jax.random.normal(k[1], (D, D), jnp.float32),
            'wv': 0.05 * jax.random.normal(k[2], (D, D), jnp.float32),
            'wo': 0.05 * jax.random.normal(k[3], (D, D), jnp.float32),
            'w1': 0.05 * jax.random.normal(k[4], (D, H), jnp.float32),
            'b1': jnp.zeros((1, H), jnp.float32),
            'w2': 0.05 * jax.random.normal(k[5], (H, D), jnp.float32),
            'b2': jnp.zeros((1, D), jnp.float32),
        })
    # SAEs tapping hidden_states indices {0, 2}; feature dim F
    sae_models = {}
    sae_key = keys[2 + n_layers]
    for i, layer_idx in enumerate((0, 2)):
        k = jax.random.split(jax.random.fold_in(sae_key, i), 2)
        sae_models[layer_idx] = {
            'w_enc': 0.05 * jax.random.normal(k[0], (D, F), jnp.float32),
            'b_enc': jnp.zeros((1, F), jnp.float32),
            'w_dec': 0.05 * jax.random.normal(k[1], (F, D), jnp.float32),
            'b_dec': jnp.zeros((1, D), jnp.float32),
        }
    return params, sae_models


# ----------------------------------------------------------------------------
# Main
# ----------------------------------------------------------------------------

if __name__ == "__main__":
    B, S, D, VOCAB, F = 2, 8, 32, 16, 64
    key = jax.random.PRNGKey(0)
    k_params, k_ids = jax.random.split(key)

    params, sae_models = init_params(k_params, vocab=VOCAB, D=D, F=F)
    packed = pack_replacement_model(params, sae_models)

    input_ids = jax.random.randint(k_ids, (B, S), 0, VOCAB, dtype=jnp.int32)
    attention_mask = jnp.array(
        [[1, 1, 1, 1, 1, 1, 1, 1],
         [1, 1, 1, 1, 1, 0, 0, 0]], dtype=jnp.float32)

    results = replacement_model_forward(input_ids, attention_mask, packed,
                                        return_features=True)

    jax.block_until_ready(results['logits'])
    for li, d in results['layer_features'].items():
        jax.block_until_ready(d['features'])
        jax.block_until_ready(d['reconstructed'])
        jax.block_until_ready(d['original'])

    # light sanity checks
    assert results['logits'].shape == (B, S, VOCAB)
    assert len(results['hidden_states']) == 3
    assert results['hidden_states'][1].shape == (B, S, D)
    assert results['attentions'][0].shape == (B, 1, S, S)
    assert results['layer_features'][0]['features'].shape == (B, F)
    assert results['layer_features'][0]['reconstructed'].shape == (B, D)
    assert results['layer_features'][2]['original'].shape == (B, D)
    assert bool(jnp.all(jnp.isfinite(results['logits'])))
    assert bool(jnp.all(jnp.isfinite(results['layer_features'][2]['features'])))

    print("KERNEL_OK")
</pallas_src>

<mosaic_0001>
module attributes {stable_mosaic.version = 11 : i64} {
  func.func @_fused_forward_kernel(%arg0: i32, %arg1: memref<1x8x32xf32, #tpu.memory_space<vmem>>, %arg2: memref<1x1x8xf32, #tpu.memory_space<vmem>>, %arg3: memref<2x32x96xbf16, #tpu.memory_space<vmem>>, %arg4: memref<2x32x32xbf16, #tpu.memory_space<vmem>>, %arg5: memref<2x32x64xbf16, #tpu.memory_space<vmem>>, %arg6: memref<2x1x64xf32, #tpu.memory_space<vmem>>, %arg7: memref<2x64x32xbf16, #tpu.memory_space<vmem>>, %arg8: memref<2x1x32xf32, #tpu.memory_space<vmem>>, %arg9: memref<32x16xbf16, #tpu.memory_space<vmem>>, %arg10: memref<1x16xf32, #tpu.memory_space<vmem>>, %arg11: memref<64x128xbf16, #tpu.memory_space<vmem>>, %arg12: memref<1x128xf32, #tpu.memory_space<vmem>>, %arg13: memref<128x64xbf16, #tpu.memory_space<vmem>>, %arg14: memref<1x64xf32, #tpu.memory_space<vmem>>, %arg15: memref<1x8x16xf32, #tpu.memory_space<vmem>>, %arg16: memref<1x2x8x32xf32, #tpu.memory_space<vmem>>, %arg17: memref<1x2x8x8xf32, #tpu.memory_space<vmem>>, %arg18: memref<1x1x128xf32, #tpu.memory_space<vmem>>, %arg19: memref<1x1x128xf32, #tpu.memory_space<vmem>>) attributes {dimension_semantics = [#tpu.dimension_semantics<parallel>], iteration_bounds = array<i64: 2>, scalar_prefetch = 0 : i64, scratch_operands = 0 : i64, tpu.core_type = #tpu.core_type<tc>, window_params = [{transform_indices = @transform_0, window_bounds = array<i64: 1, 8, 32>}, {transform_indices = @transform_1, window_bounds = array<i64: 1, 1, 8>}, {pipeline_mode = #tpu.pipeline_mode<synchronous>, transform_indices = @transform_2, window_bounds = array<i64: 2, 32, 96>}, {pipeline_mode = #tpu.pipeline_mode<synchronous>, transform_indices = @transform_3, window_bounds = array<i64: 2, 32, 32>}, {pipeline_mode = #tpu.pipeline_mode<synchronous>, transform_indices = @transform_4, window_bounds = array<i64: 2, 32, 64>}, {pipeline_mode = #tpu.pipeline_mode<synchronous>, transform_indices = @transform_5, window_bounds = array<i64: 2, 1, 64>}, {pipeline_mode = #tpu.pipeline_mode<synchronous>, transform_indices = @transform_6, window_bounds = array<i64: 2, 64, 32>}, {pipeline_mode = #tpu.pipeline_mode<synchronous>, transform_indices = @transform_7, window_bounds = array<i64: 2, 1, 32>}, {pipeline_mode = #tpu.pipeline_mode<synchronous>, transform_indices = @transform_8, window_bounds = array<i64: 32, 16>}, {pipeline_mode = #tpu.pipeline_mode<synchronous>, transform_indices = @transform_9, window_bounds = array<i64: 1, 16>}, {pipeline_mode = #tpu.pipeline_mode<synchronous>, transform_indices = @transform_10, window_bounds = array<i64: 64, 128>}, {pipeline_mode = #tpu.pipeline_mode<synchronous>, transform_indices = @transform_11, window_bounds = array<i64: 1, 128>}, {pipeline_mode = #tpu.pipeline_mode<synchronous>, transform_indices = @transform_12, window_bounds = array<i64: 128, 64>}, {pipeline_mode = #tpu.pipeline_mode<synchronous>, transform_indices = @transform_13, window_bounds = array<i64: 1, 64>}, {transform_indices = @transform_14, window_bounds = array<i64: 1, 8, 16>}, {transform_indices = @transform_15, window_bounds = array<i64: 1, 2, 8, 32>}, {transform_indices = @transform_16, window_bounds = array<i64: 1, 2, 8, 8>}, {transform_indices = @transform_17, window_bounds = array<i64: 1, 1, 128>}, {transform_indices = @transform_18, window_bounds = array<i64: 1, 1, 128>}]} {
    %c0 = arith.constant 0 : index
    %c0_0 = arith.constant 0 : index
    %c0_1 = arith.constant 0 : index
    %0 = vector.load %arg1[%c0, %c0_0, %c0_1] : memref<1x8x32xf32, #tpu.memory_space<vmem>>, vector<1x8x32xf32>
    %1 = vector.shape_cast %0 : vector<1x8x32xf32> to vector<8x32xf32>
    %c0_2 = arith.constant 0 : index
    %c0_3 = arith.constant 0 : index
    %c0_4 = arith.constant 0 : index
    %2 = vector.load %arg2[%c0_2, %c0_3, %c0_4] : memref<1x1x8xf32, #tpu.memory_space<vmem>>, vector<1x1x8xf32>
    %3 = vector.shape_cast %2 : vector<1x1x8xf32> to vector<1x8xf32>
    %cst = arith.constant 1.000000e+00 : f32
    %4 = vector.broadcast %cst : f32 to vector<1x8xf32>
    %5 = arith.subf %3, %4 : vector<1x8xf32>
    %cst_5 = arith.constant 1.000000e+09 : f32
    %6 = vector.broadcast %cst_5 : f32 to vector<1x8xf32>
    %7 = arith.mulf %5, %6 : vector<1x8xf32>
    %cst_6 = arith.constant dense<0.000000e+00> : vector<1xf32>
    %8 = vector.multi_reduction <add>, %3, %cst_6 [1] : vector<1x8xf32> to vector<1xf32>
    %9 = vector.shape_cast %8 : vector<1xf32> to vector<1x1xf32>
    %cst_7 = arith.constant 1.000000e+00 : f32
    %10 = vector.broadcast %cst_7 : f32 to vector<1x1xf32>
    %11 = arith.divf %10, %9 : vector<1x1xf32>
    %cst_8 = arith.constant dense<0.000000e+00> : vector<1x32xf32>
    %12 = tpu.matmul %3, %1, %cst_8 {dimension_numbers = #tpu.dot_dimension_numbers<[1], [0], [0], [1], [0, 0, 1, 1], [], []>} : vector<1x8xf32>, vector<8x32xf32>, vector<1x32xf32> -> vector<1x32xf32>
    %13 = arith.truncf %1 : vector<8x32xf32> to vector<8x32xbf16>
    %c0_9 = arith.constant 0 : index
    %c0_10 = arith.constant 0 : index
    %c0_11 = arith.constant 0 : index
    %14 = vector.load %arg3[%c0_9, %c0_10, %c0_11] : memref<2x32x96xbf16, #tpu.memory_space<vmem>>, vector<1x32x96xbf16>
    %15 = vector.shape_cast %14 : vector<1x32x96xbf16> to vector<32x96xbf16>
    %cst_12 = arith.constant dense<0.000000e+00> : vector<8x96xf32>
    %16 = tpu.matmul %13, %15, %cst_12 {dimension_numbers = #tpu.dot_dimension_numbers<[1], [0], [0], [1], [0, 0, 1, 1], [], []>} : vector<8x32xbf16>, vector<32x96xbf16>, vector<8x96xf32> -> vector<8x96xf32>
    %17 = vector.extract_strided_slice %16 {offsets = [0, 0], sizes = [8, 32], strides = [1, 1]} : vector<8x96xf32> to vector<8x32xf32>
    %18 = arith.truncf %17 : vector<8x32xf32> to vector<8x32xbf16>
    %19 = vector.extract_strided_slice %16 {offsets = [0, 32], sizes = [8, 32], strides = [1, 1]} : vector<8x96xf32> to vector<8x32xf32>
    %20 = arith.truncf %19 : vector<8x32xf32> to vector<8x32xbf16>
    %21 = vector.extract_strided_slice %16 {offsets = [0, 64], sizes = [8, 32], strides = [1, 1]} : vector<8x96xf32> to vector<8x32xf32>
    %22 = arith.truncf %21 : vector<8x32xf32> to vector<8x32xbf16>
    %cst_13 = arith.constant dense<0.000000e+00> : vector<8x8xf32>
    %23 = tpu.matmul %18, %20, %cst_13 {dimension_numbers = #tpu.dot_dimension_numbers<[1], [1], [0], [0], [0, 0, 1, 0], [], []>} : vector<8x32xbf16>, vector<8x32xbf16>, vector<8x8xf32> -> vector<8x8xf32>
    %cst_14 = arith.constant 0.176776692 : f32
    %24 = vector.broadcast %cst_14 : f32 to vector<8x8xf32>
    %25 = arith.mulf %23, %24 : vector<8x8xf32>
    %26 = vector.broadcast %7 : vector<1x8xf32> to vector<8x8xf32>
    %27 = arith.addf %25, %26 : vector<8x8xf32>
    %cst_15 = arith.constant dense<0xFF800000> : vector<8xf32>
    %28 = vector.multi_reduction <maximumf>, %27, %cst_15 [1] : vector<8x8xf32> to vector<8xf32>
    %29 = vector.shape_cast %28 : vector<8xf32> to vector<8x1xf32>
    %30 = vector.broadcast %29 : vector<8x1xf32> to vector<8x8xf32>
    %31 = arith.subf %27, %30 : vector<8x8xf32>
    %32 = math.exp %31 : vector<8x8xf32>
    %cst_16 = arith.constant dense<0.000000e+00> : vector<8xf32>
    %33 = vector.multi_reduction <add>, %32, %cst_16 [1] : vector<8x8xf32> to vector<8xf32>
    %34 = vector.shape_cast %33 : vector<8xf32> to vector<8x1xf32>
    %35 = tpu.reciprocal %34 {approx = true} : vector<8x1xf32> -> vector<8x1xf32>
    %36 = vector.broadcast %35 : vector<8x1xf32> to vector<8x8xf32>
    %37 = arith.mulf %32, %36 : vector<8x8xf32>
    %c0_17 = arith.constant 0 : index
    %c0_18 = arith.constant 0 : index
    %c0_19 = arith.constant 0 : index
    %c0_20 = arith.constant 0 : index
    %38 = vector.load %arg17[%c0_17, %c0_18, %c0_19, %c0_20] : memref<1x2x8x8xf32, #tpu.memory_space<vmem>>, vector<1x1x8x8xf32>
    %39 = vector.shape_cast %38 : vector<1x1x8x8xf32> to vector<8x8xf32>
    %40 = vector.shape_cast %37 : vector<8x8xf32> to vector<1x1x8x8xf32>
    tpu.vector_store %arg17[%c0_17, %c0_18, %c0_19, %c0_20], %40 {strides = array<i32>} : memref<1x2x8x8xf32, #tpu.memory_space<vmem>>, vector<1x1x8x8xf32>,
    %41 = arith.truncf %37 : vector<8x8xf32> to vector<8x8xbf16>
    %cst_21 = arith.constant dense<0.000000e+00> : vector<8x32xf32>
    %42 = tpu.matmul %41, %22, %cst_21 {dimension_numbers = #tpu.dot_dimension_numbers<[1], [0], [0], [1], [0, 0, 1, 1], [], []>} : vector<8x8xbf16>, vector<8x32xbf16>, vector<8x32xf32> -> vector<8x32xf32>
    %43 = arith.truncf %42 : vector<8x32xf32> to vector<8x32xbf16>
    %c0_22 = arith.constant 0 : index
    %c0_23 = arith.constant 0 : index
    %c0_24 = arith.constant 0 : index
    %44 = vector.load %arg4[%c0_22, %c0_23, %c0_24] : memref<2x32x32xbf16, #tpu.memory_space<vmem>>, vector<1x32x32xbf16>
    %45 = vector.shape_cast %44 : vector<1x32x32xbf16> to vector<32x32xbf16>
    %cst_25 = arith.constant dense<0.000000e+00> : vector<8x32xf32>
    %46 = tpu.matmul %43, %45, %cst_25 {dimension_numbers = #tpu.dot_dimension_numbers<[1], [0], [0], [1], [0, 0, 1, 1], [], []>} : vector<8x32xbf16>, vector<32x32xbf16>, vector<8x32xf32> -> vector<8x32xf32>
    %47 = arith.addf %1, %46 : vector<8x32xf32>
    %48 = arith.truncf %47 : vector<8x32xf32> to vector<8x32xbf16>
    %c0_26 = arith.constant 0 : index
    %c0_27 = arith.constant 0 : index
    %c0_28 = arith.constant 0 : index
    %49 = vector.load %arg5[%c0_26, %c0_27, %c0_28] : memref<2x32x64xbf16, #tpu.memory_space<vmem>>, vector<1x32x64xbf16>
    %50 = vector.shape_cast %49 : vector<1x32x64xbf16> to vector<32x64xbf16>
    %cst_29 = arith.constant dense<0.000000e+00> : vector<8x64xf32>
    %51 = tpu.matmul %48, %50, %cst_29 {dimension_numbers = #tpu.dot_dimension_numbers<[1], [0], [0], [1], [0, 0, 1, 1], [], []>} : vector<8x32xbf16>, vector<32x64xbf16>, vector<8x64xf32> -> vector<8x64xf32>
    %c0_30 = arith.constant 0 : index
    %c0_31 = arith.constant 0 : index
    %c0_32 = arith.constant 0 : index
    %52 = vector.load %arg6[%c0_30, %c0_31, %c0_32] : memref<2x1x64xf32, #tpu.memory_space<vmem>>, vector<1x1x64xf32>
    %53 = vector.shape_cast %52 : vector<1x1x64xf32> to vector<1x64xf32>
    %54 = vector.broadcast %53 : vector<1x64xf32> to vector<8x64xf32>
    %55 = arith.addf %51, %54 : vector<8x64xf32>
    %cst_33 = arith.constant 0.000000e+00 : f32
    %56 = vector.broadcast %cst_33 : f32 to vector<8x64xf32>
    %57 = arith.maximumf %55, %56 : vector<8x64xf32>
    %58 = arith.truncf %57 : vector<8x64xf32> to vector<8x64xbf16>
    %c0_34 = arith.constant 0 : index
    %c0_35 = arith.constant 0 : index
    %c0_36 = arith.constant 0 : index
    %59 = vector.load %arg7[%c0_34, %c0_35, %c0_36] : memref<2x64x32xbf16, #tpu.memory_space<vmem>>, vector<1x64x32xbf16>
    %60 = vector.shape_cast %59 : vector<1x64x32xbf16> to vector<64x32xbf16>
    %cst_37 = arith.constant dense<0.000000e+00> : vector<8x32xf32>
    %61 = tpu.matmul %58, %60, %cst_37 {dimension_numbers = #tpu.dot_dimension_numbers<[1], [0], [0], [1], [0, 0, 1, 1], [], []>} : vector<8x64xbf16>, vector<64x32xbf16>, vector<8x32xf32> -> vector<8x32xf32>
    %62 = arith.addf %47, %61 : vector<8x32xf32>
    %c0_38 = arith.constant 0 : index
    %c0_39 = arith.constant 0 : index
    %c0_40 = arith.constant 0 : index
    %63 = vector.load %arg8[%c0_38, %c0_39, %c0_40] : memref<2x1x32xf32, #tpu.memory_space<vmem>>, vector<1x1x32xf32>
    %64 = vector.shape_cast %63 : vector<1x1x32xf32> to vector<1x32xf32>
    %65 = vector.broadcast %64 : vector<1x32xf32> to vector<8x32xf32>
    %66 = arith.addf %62, %65 : vector<8x32xf32>
    %c0_41 = arith.constant 0 : index
    %c0_42 = arith.constant 0 : index
    %c0_43 = arith.constant 0 : index
    %c0_44 = arith.constant 0 : index
    %67 = vector.load %arg16[%c0_41, %c0_42, %c0_43, %c0_44] : memref<1x2x8x32xf32, #tpu.memory_space<vmem>>, vector<1x1x8x32xf32>
    %68 = vector.shape_cast %67 : vector<1x1x8x32xf32> to vector<8x32xf32>
    %69 = vector.shape_cast %66 : vector<8x32xf32> to vector<1x1x8x32xf32>
    tpu.vector_store %arg16[%c0_41, %c0_42, %c0_43, %c0_44], %69 {strides = array<i32>} : memref<1x2x8x32xf32, #tpu.memory_space<vmem>>, vector<1x1x8x32xf32>,
    %70 = arith.truncf %66 : vector<8x32xf32> to vector<8x32xbf16>
    %c1 = arith.constant 1 : index
    %c0_45 = arith.constant 0 : index
    %c0_46 = arith.constant 0 : index
    %71 = vector.load %arg3[%c1, %c0_45, %c0_46] : memref<2x32x96xbf16, #tpu.memory_space<vmem>>, vector<1x32x96xbf16>
    %72 = vector.shape_cast %71 : vector<1x32x96xbf16> to vector<32x96xbf16>
    %cst_47 = arith.constant dense<0.000000e+00> : vector<8x96xf32>
    %73 = tpu.matmul %70, %72, %cst_47 {dimension_numbers = #tpu.dot_dimension_numbers<[1], [0], [0], [1], [0, 0, 1, 1], [], []>} : vector<8x32xbf16>, vector<32x96xbf16>, vector<8x96xf32> -> vector<8x96xf32>
    %74 = vector.extract_strided_slice %73 {offsets = [0, 0], sizes = [8, 32], strides = [1, 1]} : vector<8x96xf32> to vector<8x32xf32>
    %75 = arith.truncf %74 : vector<8x32xf32> to vector<8x32xbf16>
    %76 = vector.extract_strided_slice %73 {offsets = [0, 32], sizes = [8, 32], strides = [1, 1]} : vector<8x96xf32> to vector<8x32xf32>
    %77 = arith.truncf %76 : vector<8x32xf32> to vector<8x32xbf16>
    %78 = vector.extract_strided_slice %73 {offsets = [0, 64], sizes = [8, 32], strides = [1, 1]} : vector<8x96xf32> to vector<8x32xf32>
    %79 = arith.truncf %78 : vector<8x32xf32> to vector<8x32xbf16>
    %cst_48 = arith.constant dense<0.000000e+00> : vector<8x8xf32>
    %80 = tpu.matmul %75, %77, %cst_48 {dimension_numbers = #tpu.dot_dimension_numbers<[1], [1], [0], [0], [0, 0, 1, 0], [], []>} : vector<8x32xbf16>, vector<8x32xbf16>, vector<8x8xf32> -> vector<8x8xf32>
    %cst_49 = arith.constant 0.176776692 : f32
    %81 = vector.broadcast %cst_49 : f32 to vector<8x8xf32>
    %82 = arith.mulf %80, %81 : vector<8x8xf32>
    %83 = vector.broadcast %7 : vector<1x8xf32> to vector<8x8xf32>
    %84 = arith.addf %82, %83 : vector<8x8xf32>
    %cst_50 = arith.constant dense<0xFF800000> : vector<8xf32>
    %85 = vector.multi_reduction <maximumf>, %84, %cst_50 [1] : vector<8x8xf32> to vector<8xf32>
    %86 = vector.shape_cast %85 : vector<8xf32> to vector<8x1xf32>
    %87 = vector.broadcast %86 : vector<8x1xf32> to vector<8x8xf32>
    %88 = arith.subf %84, %87 : vector<8x8xf32>
    %89 = math.exp %88 : vector<8x8xf32>
    %cst_51 = arith.constant dense<0.000000e+00> : vector<8xf32>
    %90 = vector.multi_reduction <add>, %89, %cst_51 [1] : vector<8x8xf32> to vector<8xf32>
    %91 = vector.shape_cast %90 : vector<8xf32> to vector<8x1xf32>
    %92 = tpu.reciprocal %91 {approx = true} : vector<8x1xf32> -> vector<8x1xf32>
    %93 = vector.broadcast %92 : vector<8x1xf32> to vector<8x8xf32>
    %94 = arith.mulf %89, %93 : vector<8x8xf32>
    %c0_52 = arith.constant 0 : index
    %c1_53 = arith.constant 1 : index
    %c0_54 = arith.constant 0 : index
    %c0_55 = arith.constant 0 : index
    %95 = vector.load %arg17[%c0_52, %c1_53, %c0_54, %c0_55] : memref<1x2x8x8xf32, #tpu.memory_space<vmem>>, vector<1x1x8x8xf32>
    %96 = vector.shape_cast %95 : vector<1x1x8x8xf32> to vector<8x8xf32>
    %97 = vector.shape_cast %94 : vector<8x8xf32> to vector<1x1x8x8xf32>
    tpu.vector_store %arg17[%c0_52, %c1_53, %c0_54, %c0_55], %97 {strides = array<i32>} : memref<1x2x8x8xf32, #tpu.memory_space<vmem>>, vector<1x1x8x8xf32>,
    %98 = arith.truncf %94 : vector<8x8xf32> to vector<8x8xbf16>
    %cst_56 = arith.constant dense<0.000000e+00> : vector<8x32xf32>
    %99 = tpu.matmul %98, %79, %cst_56 {dimension_numbers = #tpu.dot_dimension_numbers<[1], [0], [0], [1], [0, 0, 1, 1], [], []>} : vector<8x8xbf16>, vector<8x32xbf16>, vector<8x32xf32> -> vector<8x32xf32>
    %100 = arith.truncf %99 : vector<8x32xf32> to vector<8x32xbf16>
    %c1_57 = arith.constant 1 : index
    %c0_58 = arith.constant 0 : index
    %c0_59 = arith.constant 0 : index
    %101 = vector.load %arg4[%c1_57, %c0_58, %c0_59] : memref<2x32x32xbf16, #tpu.memory_space<vmem>>, vector<1x32x32xbf16>
    %102 = vector.shape_cast %101 : vector<1x32x32xbf16> to vector<32x32xbf16>
    %cst_60 = arith.constant dense<0.000000e+00> : vector<8x32xf32>
    %103 = tpu.matmul %100, %102, %cst_60 {dimension_numbers = #tpu.dot_dimension_numbers<[1], [0], [0], [1], [0, 0, 1, 1], [], []>} : vector<8x32xbf16>, vector<32x32xbf16>, vector<8x32xf32> -> vector<8x32xf32>
    %104 = arith.addf %66, %103 : vector<8x32xf32>
    %105 = arith.truncf %104 : vector<8x32xf32> to vector<8x32xbf16>
    %c1_61 = arith.constant 1 : index
    %c0_62 = arith.constant 0 : index
    %c0_63 = arith.constant 0 : index
    %106 = vector.load %arg5[%c1_61, %c0_62, %c0_63] : memref<2x32x64xbf16, #tpu.memory_space<vmem>>, vector<1x32x64xbf16>
    %107 = vector.shape_cast %106 : vector<1x32x64xbf16> to vector<32x64xbf16>
    %cst_64 = arith.constant dense<0.000000e+00> : vector<8x64xf32>
    %108 = tpu.matmul %105, %107, %cst_64 {dimension_numbers = #tpu.dot_dimension_numbers<[1], [0], [0], [1], [0, 0, 1, 1], [], []>} : vector<8x32xbf16>, vector<32x64xbf16>, vector<8x64xf32> -> vector<8x64xf32>
    %c1_65 = arith.constant 1 : index
    %c0_66 = arith.constant 0 : index
    %c0_67 = arith.constant 0 : index
    %109 = vector.load %arg6[%c1_65, %c0_66, %c0_67] : memref<2x1x64xf32, #tpu.memory_space<vmem>>, vector<1x1x64xf32>
    %110 = vector.shape_cast %109 : vector<1x1x64xf32> to vector<1x64xf32>
    %111 = vector.broadcast %110 : vector<1x64xf32> to vector<8x64xf32>
    %112 = arith.addf %108, %111 : vector<8x64xf32>
    %cst_68 = arith.constant 0.000000e+00 : f32
    %113 = vector.broadcast %cst_68 : f32 to vector<8x64xf32>
    %114 = arith.maximumf %112, %113 : vector<8x64xf32>
    %115 = arith.truncf %114 : vector<8x64xf32> to vector<8x64xbf16>
    %c1_69 = arith.constant 1 : index
    %c0_70 = arith.constant 0 : index
    %c0_71 = arith.constant 0 : index
    %116 = vector.load %arg7[%c1_69, %c0_70, %c0_71] : memref<2x64x32xbf16, #tpu.memory_space<vmem>>, vector<1x64x32xbf16>
    %117 = vector.shape_cast %116 : vector<1x64x32xbf16> to vector<64x32xbf16>
    %cst_72 = arith.constant dense<0.000000e+00> : vector<8x32xf32>
    %118 = tpu.matmul %115, %117, %cst_72 {dimension_numbers = #tpu.dot_dimension_numbers<[1], [0], [0], [1], [0, 0, 1, 1], [], []>} : vector<8x64xbf16>, vector<64x32xbf16>, vector<8x32xf32> -> vector<8x32xf32>
    %119 = arith.addf %104, %118 : vector<8x32xf32>
    %c1_73 = arith.constant 1 : index
    %c0_74 = arith.constant 0 : index
    %c0_75 = arith.constant 0 : index
    %120 = vector.load %arg8[%c1_73, %c0_74, %c0_75] : memref<2x1x32xf32, #tpu.memory_space<vmem>>, vector<1x1x32xf32>
    %121 = vector.shape_cast %120 : vector<1x1x32xf32> to vector<1x32xf32>
    %122 = vector.broadcast %121 : vector<1x32xf32> to vector<8x32xf32>
    %123 = arith.addf %119, %122 : vector<8x32xf32>
    %c0_76 = arith.constant 0 : index
    %c1_77 = arith.constant 1 : index
    %c0_78 = arith.constant 0 : index
    %c0_79 = arith.constant 0 : index
    %124 = vector.load %arg16[%c0_76, %c1_77, %c0_78, %c0_79] : memref<1x2x8x32xf32, #tpu.memory_space<vmem>>, vector<1x1x8x32xf32>
    %125 = vector.shape_cast %124 : vector<1x1x8x32xf32> to vector<8x32xf32>
    %126 = vector.shape_cast %123 : vector<8x32xf32> to vector<1x1x8x32xf32>
    tpu.vector_store %arg16[%c0_76, %c1_77, %c0_78, %c0_79], %126 {strides = array<i32>} : memref<1x2x8x32xf32, #tpu.memory_space<vmem>>, vector<1x1x8x32xf32>,
    %cst_80 = arith.constant dense<0.000000e+00> : vector<1x32xf32>
    %127 = tpu.matmul %3, %123, %cst_80 {dimension_numbers = #tpu.dot_dimension_numbers<[1], [0], [0], [1], [0, 0, 1, 1], [], []>} : vector<1x8xf32>, vector<8x32xf32>, vector<1x32xf32> -> vector<1x32xf32>
    %128 = arith.truncf %123 : vector<8x32xf32> to vector<8x32xbf16>
    %c0_81 = arith.constant 0 : index
    %c0_82 = arith.constant 0 : index
    %129 = vector.load %arg9[%c0_81, %c0_82] : memref<32x16xbf16, #tpu.memory_space<vmem>>, vector<32x16xbf16>
    %cst_83 = arith.constant dense<0.000000e+00> : vector<8x16xf32>
    %130 = tpu.matmul %128, %129, %cst_83 {dimension_numbers = #tpu.dot_dimension_numbers<[1], [0], [0], [1], [0, 0, 1, 1], [], []>} : vector<8x32xbf16>, vector<32x16xbf16>, vector<8x16xf32> -> vector<8x16xf32>
    %c0_84 = arith.constant 0 : index
    %c0_85 = arith.constant 0 : index
    %131 = vector.load %arg10[%c0_84, %c0_85] : memref<1x16xf32, #tpu.memory_space<vmem>>, vector<1x16xf32>
    %132 = vector.broadcast %131 : vector<1x16xf32> to vector<8x16xf32>
    %133 = arith.addf %130, %132 : vector<8x16xf32>
    %c0_86 = arith.constant 0 : index
    %c0_87 = arith.constant 0 : index
    %c0_88 = arith.constant 0 : index
    %134 = vector.load %arg15[%c0_86, %c0_87, %c0_88] : memref<1x8x16xf32, #tpu.memory_space<vmem>>, vector<1x8x16xf32>
    %135 = vector.shape_cast %134 : vector<1x8x16xf32> to vector<8x16xf32>
    %136 = vector.shape_cast %133 : vector<8x16xf32> to vector<1x8x16xf32>
    tpu.vector_store %arg15[%c0_86, %c0_87, %c0_88], %136 {strides = array<i32>} : memref<1x8x16xf32, #tpu.memory_space<vmem>>, vector<1x8x16xf32>,
    %137 = tpu.concatenate %12, %127 in 1 : vector<1x32xf32>, vector<1x32xf32> -> vector<1x64xf32>
    %138 = vector.broadcast %11 : vector<1x1xf32> to vector<1x64xf32>
    %139 = arith.mulf %137, %138 : vector<1x64xf32>
    %140 = arith.truncf %139 : vector<1x64xf32> to vector<1x64xbf16>
    %c0_89 = arith.constant 0 : index
    %c0_90 = arith.constant 0 : index
    %141 = vector.load %arg11[%c0_89, %c0_90] : memref<64x128xbf16, #tpu.memory_space<vmem>>, vector<64x128xbf16>
    %cst_91 = arith.constant dense<0.000000e+00> : vector<1x128xf32>
    %142 = tpu.matmul %140, %141, %cst_91 {dimension_numbers = #tpu.dot_dimension_numbers<[1], [0], [0], [1], [0, 0, 1, 1], [], []>} : vector<1x64xbf16>, vector<64x128xbf16>, vector<1x128xf32> -> vector<1x128xf32>
    %c0_92 = arith.constant 0 : index
    %c0_93 = arith.constant 0 : index
    %143 = vector.load %arg12[%c0_92, %c0_93] : memref<1x128xf32, #tpu.memory_space<vmem>>, vector<1x128xf32>
    %144 = arith.addf %142, %143 : vector<1x128xf32>
    %cst_94 = arith.constant 0.000000e+00 : f32
    %145 = vector.broadcast %cst_94 : f32 to vector<1x128xf32>
    %146 = arith.maximumf %144, %145 : vector<1x128xf32>
    %147 = arith.truncf %146 : vector<1x128xf32> to vector<1x128xbf16>
    %c0_95 = arith.constant 0 : index
    %c0_96 = arith.constant 0 : index
    %148 = vector.load %arg13[%c0_95, %c0_96] : memref<128x64xbf16, #tpu.memory_space<vmem>>, vector<128x64xbf16>
    %cst_97 = arith.constant dense<0.000000e+00> : vector<1x64xf32>
    %149 = tpu.matmul %147, %148, %cst_97 {dimension_numbers = #tpu.dot_dimension_numbers<[1], [0], [0], [1], [0, 0, 1, 1], [], []>} : vector<1x128xbf16>, vector<128x64xbf16>, vector<1x64xf32> -> vector<1x64xf32>
    %c0_98 = arith.constant 0 : index
    %c0_99 = arith.constant 0 : index
    %150 = vector.load %arg14[%c0_98, %c0_99] : memref<1x64xf32, #tpu.memory_space<vmem>>, vector<1x64xf32>
    %151 = arith.addf %149, %150 : vector<1x64xf32>
    %c0_100 = arith.constant 0 : index
    %c0_101 = arith.constant 0 : index
    %c0_102 = arith.constant 0 : index
    %152 = vector.load %arg19[%c0_100, %c0_101, %c0_102] : memref<1x1x128xf32, #tpu.memory_space<vmem>>, vector<1x1x128xf32>
    %153 = vector.shape_cast %152 : vector<1x1x128xf32> to vector<1x128xf32>
    %154 = vector.shape_cast %146 : vector<1x128xf32> to vector<1x1x128xf32>
    tpu.vector_store %arg19[%c0_100, %c0_101, %c0_102], %154 {strides = array<i32>} : memref<1x1x128xf32, #tpu.memory_space<vmem>>, vector<1x1x128xf32>,
    %155 = tpu.concatenate %139, %151 in 1 : vector<1x64xf32>, vector<1x64xf32> -> vector<1x128xf32>
    %c0_103 = arith.constant 0 : index
    %c0_104 = arith.constant 0 : index
    %c0_105 = arith.constant 0 : index
    %156 = vector.load %arg18[%c0_103, %c0_104, %c0_105] : memref<1x1x128xf32, #tpu.memory_space<vmem>>, vector<1x1x128xf32>
    %157 = vector.shape_cast %156 : vector<1x1x128xf32> to vector<1x128xf32>
    %158 = vector.shape_cast %155 : vector<1x128xf32> to vector<1x1x128xf32>
    tpu.vector_store %arg18[%c0_103, %c0_104, %c0_105], %158 {strides = array<i32>} : memref<1x1x128xf32, #tpu.memory_space<vmem>>, vector<1x1x128xf32>,
    return
  }
  func.func @transform_0(%arg0: i32) -> (i32, i32, i32) {
    %c0_i32 = arith.constant 0 : i32
    %c0_i32_0 = arith.constant 0 : i32
    %c0_i32_1 = arith.constant 0 : i32
    return %arg0, %c0_i32, %c0_i32_0 : i32, i32, i32
  }
  func.func @transform_1(%arg0: i32) -> (i32, i32, i32) {
    %c0_i32 = arith.constant 0 : i32
    %c0_i32_0 = arith.constant 0 : i32
    %c0_i32_1 = arith.constant 0 : i32
    return %arg0, %c0_i32, %c0_i32_0 : i32, i32, i32
  }
  func.func @transform_2(%arg0: i32) -> (i32, i32, i32) {
    %c0_i32 = arith.constant 0 : i32
    %c0_i32_0 = arith.constant 0 : i32
    %c0_i32_1 = arith.constant 0 : i32
    %c0_i32_2 = arith.constant 0 : i32
    return %c0_i32, %c0_i32_0, %c0_i32_1 : i32, i32, i32
  }
  func.func @transform_3(%arg0: i32) -> (i32, i32, i32) {
    %c0_i32 = arith.constant 0 : i32
    %c0_i32_0 = arith.constant 0 : i32
    %c0_i32_1 = arith.constant 0 : i32
    %c0_i32_2 = arith.constant 0 : i32
    return %c0_i32, %c0_i32_0, %c0_i32_1 : i32, i32, i32
  }
  func.func @transform_4(%arg0: i32) -> (i32, i32, i32) {
    %c0_i32 = arith.constant 0 : i32
    %c0_i32_0 = arith.constant 0 : i32
    %c0_i32_1 = arith.constant 0 : i32
    %c0_i32_2 = arith.constant 0 : i32
    return %c0_i32, %c0_i32_0, %c0_i32_1 : i32, i32, i32
  }
  func.func @transform_5(%arg0: i32) -> (i32, i32, i32) {
    %c0_i32 = arith.constant 0 : i32
    %c0_i32_0 = arith.constant 0 : i32
    %c0_i32_1 = arith.constant 0 : i32
    %c0_i32_2 = arith.constant 0 : i32
    return %c0_i32, %c0_i32_0, %c0_i32_1 : i32, i32, i32
  }
  func.func @transform_6(%arg0: i32) -> (i32, i32, i32) {
    %c0_i32 = arith.constant 0 : i32
    %c0_i32_0 = arith.constant 0 : i32
    %c0_i32_1 = arith.constant 0 : i32
    %c0_i32_2 = arith.constant 0 : i32
    return %c0_i32, %c0_i32_0, %c0_i32_1 : i32, i32, i32
  }
  func.func @transform_7(%arg0: i32) -> (i32, i32, i32) {
    %c0_i32 = arith.constant 0 : i32
    %c0_i32_0 = arith.constant 0 : i32
    %c0_i32_1 = arith.constant 0 : i32
    %c0_i32_2 = arith.constant 0 : i32
    return %c0_i32, %c0_i32_0, %c0_i32_1 : i32, i32, i32
  }
  func.func @transform_8(%arg0: i32) -> (i32, i32) {
    %c0_i32 = arith.constant 0 : i32
    %c0_i32_0 = arith.constant 0 : i32
    %c0_i32_1 = arith.constant 0 : i32
    return %c0_i32, %c0_i32_0 : i32, i32
  }
  func.func @transform_9(%arg0: i32) -> (i32, i32) {
    %c0_i32 = arith.constant 0 : i32
    %c0_i32_0 = arith.constant 0 : i32
    %c0_i32_1 = arith.constant 0 : i32
    return %c0_i32, %c0_i32_0 : i32, i32
  }
  func.func @transform_10(%arg0: i32) -> (i32, i32) {
    %c0_i32 = arith.constant 0 : i32
    %c0_i32_0 = arith.constant 0 : i32
    %c0_i32_1 = arith.constant 0 : i32
    return %c0_i32, %c0_i32_0 : i32, i32
  }
  func.func @transform_11(%arg0: i32) -> (i32, i32) {
    %c0_i32 = arith.constant 0 : i32
    %c0_i32_0 = arith.constant 0 : i32
    %c0_i32_1 = arith.constant 0 : i32
    return %c0_i32, %c0_i32_0 : i32, i32
  }
  func.func @transform_12(%arg0: i32) -> (i32, i32) {
    %c0_i32 = arith.constant 0 : i32
    %c0_i32_0 = arith.constant 0 : i32
    %c0_i32_1 = arith.constant 0 : i32
    return %c0_i32, %c0_i32_0 : i32, i32
  }
  func.func @transform_13(%arg0: i32) -> (i32, i32) {
    %c0_i32 = arith.constant 0 : i32
    %c0_i32_0 = arith.constant 0 : i32
    %c0_i32_1 = arith.constant 0 : i32
    return %c0_i32, %c0_i32_0 : i32, i32
  }
  func.func @transform_14(%arg0: i32) -> (i32, i32, i32) {
    %c0_i32 = arith.constant 0 : i32
    %c0_i32_0 = arith.constant 0 : i32
    %c0_i32_1 = arith.constant 0 : i32
    return %arg0, %c0_i32, %c0_i32_0 : i32, i32, i32
  }
  func.func @transform_15(%arg0: i32) -> (i32, i32, i32, i32) {
    %c0_i32 = arith.constant 0 : i32
    %c0_i32_0 = arith.constant 0 : i32
    %c0_i32_1 = arith.constant 0 : i32
    %c0_i32_2 = arith.constant 0 : i32
    return %arg0, %c0_i32, %c0_i32_0, %c0_i32_1 : i32, i32, i32, i32
  }
  func.func @transform_16(%arg0: i32) -> (i32, i32, i32, i32) {
    %c0_i32 = arith.constant 0 : i32
    %c0_i32_0 = arith.constant 0 : i32
    %c0_i32_1 = arith.constant 0 : i32
    %c0_i32_2 = arith.constant 0 : i32
    return %arg0, %c0_i32, %c0_i32_0, %c0_i32_1 : i32, i32, i32, i32
  }
  func.func @transform_17(%arg0: i32) -> (i32, i32, i32) {
    %c0_i32 = arith.constant 0 : i32
    %c0_i32_0 = arith.constant 0 : i32
    %c0_i32_1 = arith.constant 0 : i32
    return %arg0, %c0_i32, %c0_i32_0 : i32, i32, i32
  }
  func.func @transform_18(%arg0: i32) -> (i32, i32, i32) {
    %c0_i32 = arith.constant 0 : i32
    %c0_i32_0 = arith.constant 0 : i32
    %c0_i32_1 = arith.constant 0 : i32
    return %arg0, %c0_i32, %c0_i32_0 : i32, i32, i32
  }
}

</mosaic_0001>

<bundles_post_ra>
// kernel: tpu_custom_call.1
= control target key start
LH: loop header
LB: loop body
LE: loop exit
PB: predicated region body
PF: predicated region fallthrough
CT: control target
= control target key end

     0   :  { %s2589_s0 = inlined_call_operand.vmem [shape: f32[2,8,32], index: 0, kind: input, shape index: {}]   ;;  %s2590_s1 = inlined_call_operand.vmem [shape: f32[2,1,8], index: 1, kind: input, shape index: {}]   ;;  %s2591_s2 = inlined_call_operand.vmem [shape: bf16[2,32,96], index: 2, kind: input, shape index: {}]   ;;  %s2592_s3 = inlined_call_operand.vmem [shape: bf16[2,32,32], index: 3, kind: input, shape index: {}]   ;;  %s2593_s4 = inlined_call_operand.vmem [shape: bf16[2,32,64], index: 4, kind: input, shape index: {}]   ;;  %s2594_s5 = inlined_call_operand.vmem [shape: f32[2,1,64], index: 5, kind: input, shape index: {}]   ;;  %s2595_s6 = inlined_call_operand.vmem [shape: bf16[2,64,32], index: 6, kind: input, shape index: {}]   ;;  %s2596_s7 = inlined_call_operand.vmem [shape: f32[2,1,32], index: 7, kind: input, shape index: {}]   ;;  %s2597_s8 = inlined_call_operand.vmem [shape: bf16[32,16], index: 8, kind: input, shape index: {}]   ;;  %s2598_s9 = inlined_call_operand.vmem [shape: f32[1,16], index: 9, kind: input, shape index: {}]   ;;  %s2599_s10 = inlined_call_operand.vmem [shape: bf16[64,128], index: 10, kind: input, shape index: {}]   ;;  %s2600_s11 = inlined_call_operand.vmem [shape: f32[1,128], index: 11, kind: input, shape index: {}]   ;;  %s2601_s12 = inlined_call_operand.vmem [shape: bf16[128,64], index: 12, kind: input, shape index: {}]   ;;  %s2602_s13 = inlined_call_operand.vmem [shape: f32[1,64], index: 13, kind: input, shape index: {}]   ;;  %s2603_s14 = inlined_call_operand.hbm [shape: f32[2,8,16], index: 14, kind: output, shape index: {0}]   ;;  %s2604_s15 = inlined_call_operand.hbm [shape: f32[2,2,8,32], index: 15, kind: output, shape index: {1}]   ;;  %s2605_s16 = inlined_call_operand.hbm [shape: f32[2,2,8,8], index: 16, kind: output, shape index: {2}]   ;;  %s2606_s17 = inlined_call_operand.hbm [shape: f32[2,1,128], index: 17, kind: output, shape index: {3}]   ;;  %s2607_s18 = inlined_call_operand.hbm [shape: f32[2,1,128], index: 18, kind: output, shape index: {4}]  }
   0x1   :  { %2625 = sst [smem:[#allocation19_spill]] %s2589_s0 }
   0x2   :  { %2626 = sst [smem:[#allocation20_spill]] %s2590_s1 }
   0x3   :  { %2627 = sst [smem:[#allocation21_spill]] %s2591_s2 }
   0x4   :  { %2628 = sst [smem:[#allocation22_spill]] %s2592_s3 }
   0x5   :  { %2629 = sst [smem:[#allocation23_spill]] %s2593_s4 }
   0x6   :  { %2630 = sst [smem:[#allocation24_spill]] %s2594_s5 }
   0x7   :  { %2631 = sst [smem:[#allocation25_spill]] %s2595_s6 }
   0x8   :  { %2632 = sst [smem:[#allocation26_spill]] %s2596_s7 }
   0x9   :  { %2633 = sst [smem:[#allocation27_spill]] %s2597_s8 }
   0xa   :  { %2634 = sst [smem:[#allocation28_spill]] %s2598_s9 }
   0xb   :  { %2635 = sst [smem:[#allocation29_spill]] %s2599_s10 }
   0xc   :  { %24 = vsyncpa [#allocation3], 0 }
   0xd   :  { %26 = vsyncpa [#allocation3 + $0x1], 0 }
   0xe   :  { %27 = vsyncpa [#allocation5], 0 }
   0xf   :  { %29 = vsyncpa [#allocation5 + $0x1], 0 }
  0x10   :  { %30 = vsyncpa [#allocation8], 0 }
  0x11   :  { %32 = vsyncpa [#allocation8 + $0x1], 0  ;;  %s2194_s27 = smov 0   ;;  %s2196_s28 = smov 0  }
  0x12   :  { %s2198_s29 = smov 0   ;;  %s2200_s30 = smov 0  }
  0x13 LB: > { %2636 = sst [smem:[#allocation13_spill]] %s2080_s27  ;;  %s2215_s0 = sadd.s32 4294967295, %s2092_s30   ;;  %s2092_s30 = sphi %s2200_s30, %s2665_s30   ;;  %s2088_s29 = sphi %s2198_s29, %s2668_s29   ;;  %s2084_s28 = sphi %s2196_s28, %s2667_s28   ;;  %s2080_s27 = sphi %s2194_s27, %s2666_s27  }
  0x14   : > { %2637 = sst [smem:[#allocation14_spill]] %s2084_s28  ;;  %s2609_s19 = sadd.s32 4294967294, %s2092_s30  }
  0x15   : > { %2638 = sst [smem:[#allocation15_spill]] %s2088_s29  ;;  %s2219_s1 = sadd.s32 1, %s2092_s30  }
  0x16   : > { %2639 = sst [smem:[#allocation16_spill]] %s2219_s1  ;;  %s349_s20 = sadd.s32 1, %s2088_s29 }
  0x17   : > { %s346_s21 = ssub.s32 %s2092_s30, %s2219_s1  ;;  %p359_p0 = scmp.ne.s32.totalorder %s2088_s29, %s2084_s28 }
  0x18   : > { %p347_p1 = scmp.eq.s32.totalorder %s346_s21, 0  ;;  %p360_p2 = scmp.eq.s32.totalorder %s2215_s0, 1 }
  0x19   : > { %p365_p3 = scmp.ne.s32.totalorder %s2084_s28, %s2080_s27  ;;  %p366_p4 = scmp.eq.s32.totalorder %s2609_s19, 1 }
  0x1a   : > { %s2232_s22 = scalar_select %p347_p1, %s2088_s29, %s349_s20  }
  0x1b   : > { %p2234_p5 = por %p360_p2, %p359_p0  ;;  %p2238_p6 = por %p366_p4, %p365_p3 }
  0x1c   : > { %2640 = sst [smem:[#allocation17_spill]] %s2232_s22  ;;  %p1603_p7 = scmp.ge.s32.totalorder %s2092_s30, 1 }
  0x1d   : > { %s2642_s23 = scalar_select %p2238_p6, 1, 0 }
  0x1e   : > { %p537_p8 = scmp.lt.s32.totalorder %s2092_s30, 3 }
  0x1f   : > { %2643 = sst [smem:[#allocation18_spill]] %s2642_s23 }
  0x20   : > { %p538_p9 = pnand %p1603_p7, %p537_p8 }
  0x21   : > { %s2644_s26 = sld [smem:[#allocation21_spill]] (!%p538_p9)  ;;  %p611_p10 = scmp.lt.s32.totalorder (!%p538_p9), %s2215_s0, 1 }
  0x22   : > { %541 = sbr.rel (%p538_p9) target bundleno = 3024 (0xbd0), region = 76  ;;  %s2645_s23 = sld [smem:[#allocation19_spill]] (!%p538_p9) }
  0x23   : > { %s2617_s24 = smov (!%p538_p9), 96   ;;  %s2646_s1 = sld [smem:[#allocation20_spill]] (!%p538_p9) }
  0x24   : > { %s2647_s3 = sld [smem:[#allocation22_spill]] (!%p538_p9)  ;;  %s2653_s29 = smov (!%p538_p9), 96  }
  0x25   : > { %s2648_s4 = sld [smem:[#allocation23_spill]] (!%p538_p9) }
  0x26   : > { %s2649_s6 = sld [smem:[#allocation25_spill]] (!%p538_p9) }
  0x27   : > { %v1796_v0 = vld [vmem:[%s2644_s26 + $0x8] sm:$0xff]  ;;  %v1795_v1 = vld [vmem:[%s2644_s26] sm:$0xff]  ;;  %s612_s19 = scalar_select %p611_p10, %s2215_s0, 1  ;;  %vm683_vm0 = vcmask 261120   ;;  %vm642_vm1 = vcmask 64512   ;;  %vm746_vm2 = vcmask 1043456  }
  0x28   : > { %693 = vmatpush.bf16.msra.mxu1 %v1796_v0  ;;  %s2650_s5 = sld [smem:[#allocation24_spill]]  ;;  %vm868_vm3 = vcmask 523264   ;;  %v1806_v50 = vld [vmem:[%s2644_s26 + $0x18] sm:$0xff]  ;;  %v1805_v51 = vld [vmem:[%s2644_s26 + $0x10] sm:$0xff]  ;;  %vm623_vm4 = vcmask 57344   ;;  %vm1177_vm5 = vcmask 130048  }
  0x29   : > { %s1607_s22 = sshll.u32 %s612_s19, 3  ;;  %s2651_s7 = sld [smem:[#allocation26_spill]] }
  0x2a   : > { %s614_s27 = scalar_lea.vmem %s2645_s23, %s1607_s22  ;;  %s617_s22 = scalar_lea.vmem %s2646_s1, %s612_s19  ;;  %v1798_v26 = vld [vmem:[%s2647_s3 + $0x8] sm:$0xff]  ;;  %v1797_v30 = vld [vmem:[%s2647_s3] sm:$0xff] }
  0x2b   : > { %v2255_v2 = vld [vmem:[%s614_s27] sm:$0xff]  ;;  %s2615_s19 = smov 64   ;;  %s2281_s23 = sand.u32 1, %s2084_s28   ;;  %v1800_v31 = vld [vmem:[%s2648_s4 + $0x8] sm:$0xff] }
  0x2c   : > { %694 = vmatpush.bf16.msra.mxu1 %v1795_v1  ;;  %v666_v3 = vpack.c.bf16 %v2255_v2, %v2255_v2  ;;  %661 = vmatpush.msra.mxu0 %v2255_v2  ;;  %v2267_v9 = vld [vmem:[%s617_s22] sm:$0x1]  ;;  %s2618_s25 = sshll.u32 %s2281_s23, 4  ;;  %v1804_v36 = vld [vmem:[%s2649_s6 + $0x18] sm:$0xff]  ;;  %v1803_v37 = vld [vmem:[%s2649_s6 + $0x10] sm:$0xff]  ;;  %s2652_s21 = sshll.u32 %s2281_s23, 4 }
  0x2d   : > { %1609 = vmatmul.msk.f32.vlgmr.msra.gmra.mxu0 %vm642_vm1, %v2267_v9  ;;  %v1608_v10 = vadd.f32 -1.0, %v2267_v9  ;;  %s2286_s20 = scalar_lea.vmem [#allocation6], %s2618_s25  ;;  %v1799_v35 = vld [vmem:[%s2648_s4] sm:$0xff]  ;;  %v1802_v42 = vld [vmem:[%s2649_s6 + $0x8] sm:$0xff]  ;;  %s2334_s27 = scalar_lea.vmem [#allocation4], %s2652_s21 }
  0x2e   : > { %v1801_v43 = vld [vmem:[%s2649_s6] sm:$0xff]  ;;  %s2654_s1 = smov 64   ;;  %s2655_s8 = sld [smem:[#allocation27_spill]] }
  0x2f   : > { %1618 = vmatmul.msk.bf16.vlgmr.msra.gmra.mxu1 %vm683_vm0, %v666_v3  ;;  %v2272_v11 = vmul.f32 1e+09, %v1608_v10  ;;  %v1895_v44 = vld [vmem:[%s2650_s5] ss:$0 sm:$0xff]  ;;  %s2656_s10 = sld [smem:[#allocation29_spill]]  ;;  %s2096_s22 = smov 32  }
  0x30   : > { %876 = vmatpush.bf16.msrb.mxu1 %v1804_v36  ;;  %v1896_v52 = vld [vmem:[%s2651_s7] ss:$0 sm:$0xff]  ;;  %s2657_s9 = sld [smem:[#allocation28_spill]]  ;;  %s1829_s28 = sshll.u32 %s2215_s0, 4 }
  0x31   : > { %v725_v12 = vperm.slane %v2272_v11, 0  ;;  %v1808_v11 = vld [vmem:[%s2647_s3 + $0x18] sm:$0xff]  ;;  %s1366_s25 = scalar_lea.hbm %s2604_s15, %s1829_s28 }
  0x32   : > { %s1369_s21 = sshll.u32 %s1366_s25, 4  ;;  %s1370_s21 = int_to_ptr.hbm [resolvable:$true] %s1369_s21 }
  0x34   : > { %877 = vmatpush.bf16.msrb.mxu1 %v1803_v37 }
  0x38   : > { %878 = vmatpush.bf16.msrb.mxu1 %v1802_v42 }
  0x3c   : > { %879 = vmatpush.bf16.msrb.mxu1 %v1801_v43 }
  0x40   : > { %1013 = vmatpush.bf16.msra.mxu1 %v1808_v11 }
  0xaa   : > { %v2342_v63 = vpop.f32.mrf.mxu0 }
  0xac   : > { %v696_v4 = vpop.f32.mrf.mxu1 }
  0xad   : > { %v700_v5 = vpack.c.bf16 %v696_v4, %v696_v4 }
  0xaf   : > { %702 = vrot.lane.b32.xlu0 %v700_v5, %s2617_s24  ;;  %s1930_s24 = scalar_lea.hbm %s2604_s15, 32 }
  0xb4   : > { %v698_v6 = vpop.f32.mrf.mxu1 }
 0x121   : > { %v703_v7 = vpop.permute.xlu0 %702 }
 0x122   : > { %v708_v8 = vsel %vm683_vm0, %v703_v7, 0 }
 0x123   : > { %717 = vmatpush.bf16.xpose.msra.mxu2 %v708_v8 }
 0x12a   : > { %1619 = vmatmul.msk.bf16.vlgmr.msra.gmra.mxu2 %vm683_vm0, %v700_v5 }
 0x12b   : > { %919 = vmatpush.bf16.msrb.mxu2 %v1806_v50 }
 0x12f   : > { %920 = vmatpush.bf16.msrb.mxu2 %v1805_v51 }
 0x1ad   : > { %v719_v13 = vpop.f32.mrf.mxu2 }
 0x1ae   : > { %v723_v14 = vmul.f32 0.17677669, %v719_v13 }
 0x1b0   : > { %v727_v15 = vadd.f32 %v725_v12, %v723_v14 }
 0x1b2   : > { %v728_v16 = vsel %vm642_vm1, %v727_v15, -inf }
 0x1b3   : > { %729 = vmax.xlane.f32.xlu0 %v728_v16 }
 0x1b5   : > { %v721_v17 = vpop.f32.mrf.mxu2 }
 0x226   : > { %v730_v18 = vpop.xlane.xlu0 %729 }
 0x227   : > { %v731_v19 = vsub.f32 %v727_v15, %v730_v18  ;;  %v1807_v18 = vld [vmem:[%s2647_s3 + $0x10] sm:$0xff]  ;;  %s1604_s3 = sshll.u32 %s2281_s23, 3 }
 0x228   : > { %1014 = vmatpush.bf16.msra.mxu1 %v1807_v18  ;;  %s2411_s26 = scalar_lea.vmem [#allocation2], %s1604_s3  ;;  %s2621_s3 = scalar_lea.vmem [#allocation9], %s2281_s23 }
 0x229   : > { %v732_v20 = vmul.f32 1.442695, %v731_v19  ;;  %v1810_v19 = vld [vmem:[%s2648_s4 + $0x18] sm:$0xff] }
 0x22a   : > { %1053 = vmatpush.bf16.msra.mxu2 %v1810_v19 }
 0x22b   : > { %1900 = vpow2.f32 %v732_v20 }
 0x231   : > { %v1901_v21 = vpop.eup %1900 }
 0x232   : > { %v734_v22 = vsel %vm642_vm1, %v1901_v21, 0.0 }
 0x233   : > { %735 = vadd.xlane.f32.xlu1 %v734_v22 }
 0x24c   : > { %741 = vrot.lane.b32.xlu1 %v700_v5, %s2615_s19  ;;  %s1367_s19 = sshll.u32 %s2334_s27, 4  ;;  %s1368_s19 = int_to_ptr.vmem [resolvable:$true] %s1367_s19 }
 0x2a6   : > { %v736_v23 = vpop.xlane.xlu1 %735 }
 0x2a7   : > { %1902 = vrcp.f32 %v736_v23  ;;  %v1809_v23 = vld [vmem:[%s2648_s4 + $0x10] sm:$0xff]  ;;  %s2622_s4 = sand.u32 1, %s2215_s0  }
 0x2a8   : > { %1054 = vmatpush.bf16.msra.mxu2 %v1809_v23 }
 0x2ad   : > { %v1903_v24 = vpop.eup %1902 }
 0x2ae   : > { %v738_v25 = vmul.f32 %v1903_v24, %v1901_v21  ;;  %v1814_v24 = vld [vmem:[%s2649_s6 + $0x38] sm:$0xff] }
 0x2b0   : > { %739 = vst.msk [vmem:[%s2286_s20] sm:$0xff] %vm642_vm1, %v738_v25  ;;  %v740_v29 = vpack.c.bf16 %v738_v25, %v738_v25  ;;  %v1813_v25 = vld [vmem:[%s2649_s6 + $0x30] sm:$0xff] }
 0x2be   : > { %v742_v27 = vpop.permute.xlu1 %741 }
 0x2bf   : > { %v748_v28 = vsel %vm746_vm2, %v742_v27, 0 }
 0x2c0   : > { %757 = vmatpush.bf16.msra.mxu3 %v748_v28 }
 0x2c3   : > { %1620 = vmatmul.msk.bf16.vlgmr.msra.gmra.mxu3 %vm642_vm1, %v740_v29 }
 0x2c4   : > { %789 = vmatpush.bf16.msrb.mxu3 %v1798_v26 }
 0x2c8   : > { %790 = vmatpush.bf16.msrb.mxu3 %v1797_v30  ;;  %v1812_v30 = vld [vmem:[%s2649_s6 + $0x28] sm:$0xff] }
 0x2cc   : > { %827 = vmatpush.bf16.msra.mxu3 %v1800_v31  ;;  %v1811_v31 = vld [vmem:[%s2649_s6 + $0x20] sm:$0xff]  ;;  %s1383_s6 = scalar_lea.hbm %s2605_s16, %s1829_s28 }
 0x2d0   : > { %828 = vmatpush.bf16.msra.mxu3 %v1799_v35 }
 0x346   : > { %v759_v32 = vpop.f32.mrf.mxu3 }
 0x347   : > { %v763_v33 = vpack.c.bf16 %v759_v32, %v759_v32  ;;  %v1897_v32 = vld [vmem:[%s2650_s5 + $0x1] ss:$0 sm:$0xff] }
 0x349   : > { %1629 = vmatmul.msk.bf16.vlgmr.msrb.gmra.mxu3 %vm683_vm0, %v763_v33 }
 0x34e   : > { %v761_v34 = vpop.f32.mrf.mxu3 }
 0x3cc   : > { %v792_v38 = vpop.f32.mrf.mxu3 }
 0x3cd   : > { %v796_v39 = vadd.f32 %v792_v38, %v2255_v2  ;;  %v1816_v38 = vld [vmem:[%s2655_s8 + $0x8] sm:$0xff] }
 0x3cf   : > { %v797_v40 = vpack.c.bf16 %v796_v39, %v796_v39 }
 0x3d1   : > { %1638 = vmatmul.msk.bf16.vlgmr.msra.gmra.mxu3 %vm683_vm0, %v797_v40  ;;  %v624_v40 = vsel %vm623_vm4, %v2267_v9, 0.0 }
 0x3d2   : > { %625 = vadd.xlane.f32.xlu0 %v624_v40 }
 0x3d4   : > { %v794_v41 = vpop.f32.mrf.mxu3 }
 0x3d5   : > { %v1898_v41 = vld [vmem:[%s2651_s7 + $0x1] ss:$0 sm:$0xff]  ;;  %s2465_s7 = scalar_lea.sflag [#allocation5], %s2622_s4 }
 0x454   : > { %v830_v45 = vpop.f32.mrf.mxu3 }
 0x455   : > { %v831_v46 = vadd.f32 %v1895_v44, %v830_v45 }
 0x457   : > { %v834_v47 = vmax.f32 %v831_v46, 0.0 }
 0x459   : > { %v835_v48 = vpack.c.bf16 %v834_v47, %v834_v47  ;;  %v1820_v47 = vld [vmem:[%s2656_s10 + $0x18] sm:$0xff] }
 0x45b   : > { %1655 = vmatmul.msk.bf16.vlgmr.msrb.gmra.mxu1 %vm868_vm3, %v835_v48  ;;  %v1819_v48 = vld [vmem:[%s2656_s10 + $0x10] sm:$0xff] }
 0x45c   : > { %v832_v49 = vpop.f32.mrf.mxu3  ;;  %1170 = vmatpush.bf16.msrb.mxu1 %v1816_v38 }
 0x45d   : > { %v1818_v49 = vld [vmem:[%s2656_s10 + $0x8] sm:$0xff] }
 0x4d8   : > { %v881_v53 = vpop.f32.mrf.mxu1 }
 0x4d9   : > { %v885_v54 = vadd.f32 %v881_v53, %v796_v39  ;;  %v1815_v39 = vld [vmem:[%s2655_s8] sm:$0xff] }
 0x4da   : > { %1171 = vmatpush.bf16.msrb.mxu1 %v1815_v39 }
 0x4db   : > { %v890_v55 = vadd.f32 %v1896_v52, %v885_v54  ;;  %v1817_v54 = vld [vmem:[%s2656_s10] sm:$0xff] }
 0x4dd   : > { %891 = vst.msk [vmem:[%s2334_s27] sm:$0xff] %vm683_vm0, %v890_v55  ;;  %v892_v56 = vpack.c.bf16 %v890_v55, %v890_v55 }
 0x4df   : > { %1668 = vmatmul.msk.bf16.vlgmr.msrb.gmra.mxu2 %vm683_vm0, %v892_v56  ;;  %v1828_v56 = vld [vmem:[%s2601_s12 + $0x38] sm:$0xff] }
 0x4e0   : > { %v883_v57 = vpop.f32.mrf.mxu1  ;;  %1226 = vmatpush.bf16.msrb.mxu2 %v1820_v47 }
 0x4e1   : > { %v1827_v57 = vld [vmem:[%s2601_s12 + $0x30] sm:$0xff] }
 0x4e4   : > { %1227 = vmatpush.bf16.msrb.mxu2 %v1819_v48 }
 0x4e8   : > { %1228 = vmatpush.bf16.msrb.mxu2 %v1818_v49 }
 0x4ec   : > { %1229 = vmatpush.bf16.msrb.mxu2 %v1817_v54 }
 0x562   : > { %v922_v58 = vpop.f32.mrf.mxu2 }
 0x563   : > { %v926_v59 = vpack.c.bf16 %v922_v58, %v922_v58 }
 0x565   : > { %928 = vrot.lane.b32.xlu2 %v926_v59, %s2653_s29 }
 0x56a   : > { %v924_v60 = vpop.f32.mrf.mxu2 }
 0x5bf   : > { %v929_v61 = vpop.permute.xlu2 %928 }
 0x5c0   : > { %v934_v62 = vsel %vm683_vm0, %v929_v61, 0  ;;  %v1825_v61 = vld [vmem:[%s2601_s12 + $0x20] sm:$0xff] }
 0x5c1   : > { %943 = vmatpush.bf16.xpose.msrb.mxu0 %v934_v62 }
 0x5c8   : > { %1669 = vmatmul.msk.bf16.vlgmr.msrb.gmra.mxu0 %vm683_vm0, %v926_v59 }
 0x5c9   : > { %1102 = vmatpush.bf16.msra.mxu0 %v1814_v24 }
 0x5cd   : > { %1103 = vmatpush.bf16.msra.mxu0 %v1813_v25 }
 0x5d1   : > { %1104 = vmatpush.bf16.msra.mxu0 %v1812_v30 }
 0x5d5   : > { %1105 = vmatpush.bf16.msra.mxu0 %v1811_v31 }
 0x5d9   : > { %1302 = vmatpush.bf16.msrb.mxu0 %v1828_v56 }
 0x5dd   : > { %1303 = vmatpush.bf16.msrb.mxu0 %v1827_v57 }
 0x645   : > { %v945_v0 = vpop.f32.mrf.mxu0 }
 0x646   : > { %v949_v1 = vmul.f32 0.17677669, %v945_v0  ;;  %v1824_v0 = vld [vmem:[%s2601_s12 + $0x18] sm:$0xff] }
 0x648   : > { %v950_v2 = vadd.f32 %v949_v1, %v725_v12 }
 0x64a   : > { %v951_v3 = vsel %vm642_vm1, %v950_v2, -inf }
 0x64b   : > { %952 = vmax.xlane.f32.xlu2 %v951_v3 }
 0x64d   : > { %v947_v4 = vpop.f32.mrf.mxu0 }
 0x663   : > { %965 = vrot.lane.b32.xlu2 %v926_v59, %s2654_s1  ;;  %v1826_v59 = vld [vmem:[%s2601_s12 + $0x28] sm:$0xff] }
 0x664   : > { %1304 = vmatpush.bf16.msrb.mxu0 %v1826_v59 }
 0x668   : > { %1305 = vmatpush.bf16.msrb.mxu0 %v1825_v61 }
 0x66c   : > { %1306 = vmatpush.bf16.msrb.mxu0 %v1824_v0 }
 0x6be   : > { %v953_v5 = vpop.xlane.xlu2 %952 }
 0x6bf   : > { %v954_v6 = vsub.f32 %v950_v2, %v953_v5  ;;  %v1823_v2 = vld [vmem:[%s2601_s12 + $0x10] sm:$0xff] }
 0x6c0   : > { %1307 = vmatpush.bf16.msrb.mxu0 %v1823_v2 }
 0x6c1   : > { %v955_v7 = vmul.f32 1.442695, %v954_v6 }
 0x6c3   : > { %1904 = vpow2.f32 %v955_v7 }
 0x6c6   : > { %v966_v8 = vpop.permute.xlu2 %965 }
 0x6c7   : > { %v971_v10 = vsel %vm746_vm2, %v966_v8, 0 }
 0x6c8   : > { %980 = vmatpush.bf16.msrb.mxu3 %v971_v10 }
 0x6c9   : > { %v1905_v13 = vpop.eup %1904 }
 0x6ca   : > { %v957_v14 = vsel %vm642_vm1, %v1905_v13, 0.0 }
 0x6cb   : > { %958 = vadd.xlane.f32.xlu1 %v957_v14 }
 0x73e   : > { %v959_v12 = vpop.xlane.xlu1 %958 }
 0x73f   : > { %1906 = vrcp.f32 %v959_v12  ;;  %v1822_v12 = vld [vmem:[%s2601_s12 + $0x8] sm:$0xff] }
 0x740   : > { %1308 = vmatpush.bf16.msrb.mxu0 %v1822_v12 }
 0x745   : > { %v1907_v15 = vpop.eup %1906 }
 0x746   : > { %v961_v16 = vmul.f32 %v1907_v15, %v1905_v13  ;;  %v1821_v15 = vld [vmem:[%s2601_s12] sm:$0xff] }
 0x747   : > { %1309 = vmatpush.bf16.msrb.mxu0 %v1821_v15 }
 0x748   : > { %1670 = vst.msk [vmem:[%s2286_s20 + $0x8] sm:$0xff] %vm642_vm1, %v961_v16  ;;  %v964_v17 = vpack.c.bf16 %v961_v16, %v961_v16 }
 0x74a   : > { %1671 = vmatmul.msk.bf16.vlgmr.msrb.gmra.mxu3 %vm642_vm1, %v964_v17 }
 0x7cd   : > { %v982_v20 = vpop.f32.mrf.mxu3 }
 0x7ce   : > { %v986_v21 = vpack.c.bf16 %v982_v20, %v982_v20 }
 0x7d0   : > { %1684 = vmatmul.msk.bf16.vlgmr.msra.gmra.mxu1 %vm683_vm0, %v986_v21 }
 0x7d5   : > { %v984_v22 = vpop.f32.mrf.mxu3 }
 0x84d   : > { %v1016_v26 = vpop.f32.mrf.mxu1 }
 0x84e   : > { %v1020_v27 = vadd.f32 %v1016_v26, %v890_v55  ;;  %v626_v55 = vpop.xlane.xlu0 %625 }
 0x84f   : > { %1908 = vrcp.f32 %v626_v55  ;;  %vm632_vm6 = vweird.f32 %v626_v55  ;;  %v638_v3 = vand.u32 2147483648, %v626_v55  ;;  %v636_v5 = vand.u32 2147483647, %v626_v55 }
 0x850   : > { %v1021_v28 = vpack.c.bf16 %v1020_v27, %v1020_v27 }
 0x851   : > { %v639_v6 = vor.u32 1.1754944e-38, %v638_v3  ;;  %vm637_vm9 = vcmp.eq.f32.partialorder %v636_v5, 8.507059e+37 }
 0x852   : > { %1698 = vmatmul.msk.bf16.vlgmr.msra.gmra.mxu2 %vm683_vm0, %v1021_v28 }
 0x855   : > { %v1018_v29 = vpop.f32.mrf.mxu1  ;;  %v1909_v58 = vpop.eup %1908 }
 0x856   : > { %v628_v60 = vmul.f32 %v1909_v58, %v626_v55  ;;  %vm633_vm7 = vweird.f32 %v1909_v58 }
 0x857   : > { %vm634_vm8 = vmor %vm632_vm6, %vm633_vm7 }
 0x858   : > { %v629_v62 = vsub.f32 1.0, %v628_v60 }
 0x85a   : > { %v630_v1 = vmul.f32 %v1909_v58, %v629_v62 }
 0x85c   : > { %v631_v4 = vadd.f32 %v1909_v58, %v630_v1 }
 0x85e   : > { %v635_v7 = vsel %vm634_vm8, %v1909_v58, %v631_v4 }
 0x85f   : > { %v640_v10 = vsel %vm637_vm9, %v639_v6, %v635_v7 }
 0x8d5   : > { %v1056_v33 = vpop.f32.mrf.mxu2 }
 0x8d6   : > { %v1057_v34 = vadd.f32 %v1897_v32, %v1056_v33 }
 0x8d8   : > { %v1060_v35 = vmax.f32 %v1057_v34, 0.0 }
 0x8da   : > { %v1061_v36 = vpack.c.bf16 %v1060_v35, %v1060_v35 }
 0x8dc   : > { %1723 = vmatmul.msk.bf16.vlgmr.msra.gmra.mxu0 %vm868_vm3, %v1061_v36 }
 0x8dd   : > { %v1058_v37 = vpop.f32.mrf.mxu2 }
 0x959   : > { %v1107_v42 = vpop.f32.mrf.mxu0 }
 0x95a   : > { %v1111_v43 = vadd.f32 %v1107_v42, %v1020_v27 }
 0x95c   : > { %v1117_v44 = vadd.f32 %v1898_v41, %v1111_v43 }
 0x95e   : > { %1725 = vst.msk [vmem:[%s2334_s27 + $0x8] sm:$0xff] %vm683_vm0, %v1117_v44  ;;  %v1140_v45 = vpack.c.bf16 %v1117_v44, %v1117_v44  ;;  %1135 = vmatpush.msra.mxu3 %v1117_v44 }
 0x95f   : > { %1726 = vmatmul.msk.f32.vlgmr.msra.gmra.mxu3 %vm642_vm1, %v2267_v9  ;;  %v1899_v9 = vld [vmem:[%s2657_s9] ss:$0 sm:$0xff] }
 0x960   : > { %1735 = vmatmul.msk.bf16.vlgmr.msrb.gmra.mxu1 %vm683_vm0, %v1140_v45 }
 0x961   : > { %v1109_v46 = vpop.f32.mrf.mxu0 }
 0x9dd   : > { %v1173_v50 = vpop.f32.mrf.mxu1 }
 0x9de   : > { %v1174_v51 = vadd.f32 %v1899_v9, %v1173_v50 }
 0x9e0   : > { %1178 = vst.msk [vmem:[%s2411_s26] sm:$0xff] %vm1177_vm5, %v1174_v51 }
 0x9e2   : > { %v1137_v52 = vpop.f32.mrf.mxu3 }
 0x9e3   : > { %1180 = vrot.lane.b32.xlu0 %v1137_v52, %s2096_s22 }
 0x9e5   : > { %v1175_v53 = vpop.f32.mrf.mxu1 }
 0xa55   : > { %v1181_v8 = vpop.permute.xlu0 %1180 }
 0xa56   : > { %v1183_v13 = vsel %vm683_vm0, %v2342_v63, %v1181_v8  ;;  %v1194_v63 = vld [vmem:[%s2600_s11] sm:$0x1] }
 0xa57   : > { %v2437_v14 = vmul.f32 %v1183_v13, %v640_v10 }
 0xa59   : > { %v1185_v11 = vpack.c.bf16 %v2437_v14, %v2437_v14 }
 0xa5b   : > { %1752 = vmatmul.msk.bf16.vlgmr.msrb.gmra.mxu2 %vm868_vm3, %v1185_v11 }
 0xade   : > { %v1231_v16 = vpop.f32.mrf.mxu2 }
 0xadf   : > { %v1232_v17 = vadd.f32 %v1231_v16, %v1194_v63 }
 0xae1   : > { %v1235_v18 = vmax.f32 %v1232_v17, 0.0 }
 0xae3   : > { %v1236_v19 = vpack.c.bf16 %v1235_v18, %v1235_v18  ;;  %1315 = vst [vmem:[%s2621_s3] sm:$0x1] %v1235_v18  ;;  %s1924_s3 = sshra.s32 %s1370_s21, 4  ;;  %s1925_s3 = int_to_ptr.hbm [resolvable:$true] %s1924_s3 }
 0xae4   : > { %s1926_s8 = scalar_lea.hbm %s1925_s3, 16  ;;  %p1931_p0 = scmp.lt.s32.totalorder %s1925_s3, %s2604_s15 }
 0xae5   : > { %1310 = vmatmul.bf16.vlgmr.msrb.gmra.mxu0 %v1236_v19  ;;  %p1927_p11 = scmp.ne.s32.totalorder %s1925_s3, %s1926_s8  ;;  %p1932_p1 = scmp.lt.s32.totalorder %s1930_s24, %s1926_s8 }
 0xae6   : > { %v1233_v20 = vpop.f32.mrf.mxu2 }
 0xae7   : > { %p1928_p12 = pnand %p1927_p11, %p2234_p5  ;;  %p1933_p2 = por %p1932_p1, %p1931_p0 }
 0xae9   : > { %p1929_p13 = pneg %p1928_p12 }
 0xaeb   : > { %p1934_p3 = pnand %p1933_p2, %p1929_p13 }
 0xaed   : > { %1937 = shalt.err (!%p1934_p3)
}
 0xaee   : > { %s2623_s5 = smov 128   ;;  %s2624_s28 = smov 8  }
 0xaef   : > { %1832 = dma.vmem_to_hbm [thread:$0]  (%p2234_p5), %s1368_s19, 256, %s1370_s21, %s2465_s7, %s2623_s5, %s2623_s5, %s2624_s28  }
 0xaf0   : > { %s1384_s9 = sshll.u32 %s2286_s20, 4  ;;  %s1386_s3 = sshll.u32 %s1383_s6, 4  ;;  %s2482_s9 = int_to_ptr.vmem [resolvable:$true] %s1384_s9  ;;  %s2484_s3 = int_to_ptr.hbm [resolvable:$true] %s1386_s3 }
 0xaf1   : > { %s1788_s8 = sshll.u32 %s2215_s0, 3  ;;  %s1353_s24 = sshll.u32 %s2411_s26, 4  ;;  %s1354_s24 = int_to_ptr.vmem [resolvable:$true] %s1353_s24 }
 0xaf2   : > { %s1351_s22 = scalar_lea.hbm %s2603_s14, %s1788_s8  ;;  %s1323_s4 = scalar_lea.sflag [#allocation3], %s2281_s23 }
 0xaf3   : > { %s1355_s25 = sshll.u32 %s1351_s22, 4  ;;  %s1958_s21 = scalar_lea.hbm %s2603_s14, 16  ;;  %s1356_s25 = int_to_ptr.hbm [resolvable:$true] %s1355_s25 }
 0xaf4   : > { %s1952_s10 = sshra.s32 %s1356_s25, 4  ;;  %s1953_s10 = int_to_ptr.hbm [resolvable:$true] %s1952_s10 }
 0xaf5   : > { %s1954_s19 = scalar_lea.hbm %s1953_s10, 8  ;;  %p1959_p9 = scmp.lt.s32.totalorder %s1953_s10, %s2603_s14 }
 0xaf6   : > { %p1955_p4 = scmp.ne.s32.totalorder %s1953_s10, %s1954_s19  ;;  %p1960_p10 = scmp.lt.s32.totalorder %s1958_s21, %s1954_s19 }
 0xaf8   : > { %p1956_p7 = pnand %p1955_p4, %p2234_p5  ;;  %p1961_p11 = por %p1960_p10, %p1959_p9 }
 0xafa   : > { %p1957_p8 = pneg %p1956_p7 }
 0xafc   : > { %p1962_p12 = pnand %p1961_p11, %p1957_p8 }
 0xafe   : > { %1965 = shalt.err (!%p1962_p12)
}
 0xaff   : > { %1831 = dma.vmem_to_hbm [thread:$0]  (%p2234_p5), %s1354_s24, 128, %s1356_s25, %s1323_s4  }
 0xb00   : > { %s1980_s26 = sshra.s32 %s2484_s3, 4  ;;  %s1986_s10 = scalar_lea.hbm %s2605_s16, 32  ;;  %s1981_s26 = int_to_ptr.hbm [resolvable:$true] %s1980_s26 }
 0xb01   : > { %s1982_s8 = scalar_lea.hbm %s1981_s26, 16  ;;  %p1987_p2 = scmp.lt.s32.totalorder %s1981_s26, %s2605_s16 }
 0xb02   : > { %p1983_p13 = scmp.ne.s32.totalorder %s1981_s26, %s1982_s8  ;;  %p1988_p3 = scmp.lt.s32.totalorder %s1986_s10, %s1982_s8 }
 0xb04   : > { %p1984_p0 = pnand %p1983_p13, %p2234_p5  ;;  %p1989_p4 = por %p1988_p3, %p1987_p2 }
 0xb06   : > { %p1985_p1 = pneg %p1984_p0 }
 0xb08   : > { %p1990_p7 = pnand %p1989_p4, %p1985_p1 }
 0xb0a   : > { %1993 = shalt.err (!%p1990_p7)
}
 0xb0b   : > { %s2658_s4 = smov 8   ;;  %s2659_s22 = smov 128   ;;  %v1253_v21 = vld [vmem:[%s2602_s13] sm:$0x1] }
 0xb0c   : > { %1833 = dma.vmem_to_hbm [thread:$0]  (%p2234_p5), %s2482_s9, 256, %s2484_s3, %s2465_s7, %s2659_s22, %s2659_s22, %s2658_s4  }
 0xb0d   : > { %s1398_s20 = scalar_lea.hbm %s2606_s17, %s2215_s0  ;;  %s1411_s8 = scalar_lea.hbm %s2607_s18, %s2215_s0 }
 0xb0e   : > { %s604_s29 = scalar_lea.vmem [#allocation7], %s2281_s23  ;;  %s1402_s9 = sshll.u32 %s1398_s20, 4  ;;  %s1403_s9 = int_to_ptr.hbm [resolvable:$true] %s1402_s9 }
 0xb0f   : > { %s1400_s7 = sshll.u32 %s604_s29, 4  ;;  %s2660_s3 = scalar_lea.vmem [#allocation9], %s2281_s23  ;;  %s1401_s7 = int_to_ptr.vmem [resolvable:$true] %s1400_s7 }
 0xb10   : > { %s2534_s27 = sshll.u32 %s2660_s3, 4  ;;  %s2536_s10 = sshll.u32 %s1411_s8, 4  ;;  %s1414_s27 = int_to_ptr.vmem [resolvable:$true] %s2534_s27  ;;  %s1416_s10 = int_to_ptr.hbm [resolvable:$true] %s2536_s10 }
 0xb11   : > { %s2008_s28 = sshra.s32 %s1403_s9, 4  ;;  %s2014_s24 = scalar_lea.hbm %s2606_s17, 2  ;;  %s2009_s28 = int_to_ptr.hbm [resolvable:$true] %s2008_s28 }
 0xb12   : > { %s2010_s23 = scalar_lea.hbm %s2009_s28, 1  ;;  %p2015_p11 = scmp.lt.s32.totalorder %s2009_s28, %s2606_s17 }
 0xb13   : > { %p2011_p8 = scmp.ne.s32.totalorder %s2009_s28, %s2010_s23  ;;  %p2016_p12 = scmp.lt.s32.totalorder %s2014_s24, %s2010_s23 }
 0xb15   : > { %p2012_p9 = pnand %p2011_p8, %p2234_p5  ;;  %p2017_p13 = por %p2016_p12, %p2015_p11 }
 0xb17   : > { %p2013_p10 = pneg %p2012_p9 }
 0xb19   : > { %p2018_p0 = pnand %p2017_p13, %p2013_p10 }
 0xb62   : > { %v1311_v22 = vpop.f32.mrf.mxu0 }
 0xb63   : > { %v1312_v23 = vadd.f32 %v1311_v22, %v1253_v21 }
 0xb65   : > { %1317 = vrot.lane.b32.xlu2 %v1312_v23, %s2654_s1  ;;  %s2661_s1 = sand.u32 1, %s2215_s0  }
 0xb66   : > { %s1338_s5 = scalar_lea.sflag [#allocation8], %s2661_s1 }
 0xb6a   : > { %v1313_v24 = vpop.f32.mrf.mxu0 }
 0xbbf   : > { %v1318_v25 = vpop.permute.xlu2 %1317 }
 0xbc0   : > { %v1320_v26 = vsel %vm868_vm3, %v2437_v14, %v1318_v25 }
 0xbc1   : > { %1321 = vst [vmem:[%s604_s29] sm:$0x1] %v1320_v26 }
 0xbc2   : > { %2021 = shalt.err (!%p2018_p0)
}
 0xbc3   : > { %1834 = dma.vmem_to_hbm [thread:$0]  (%p2234_p5), %s1401_s7, 16, %s1403_s9, %s1338_s5  }
 0xbc4   : > { %s2036_s0 = sshra.s32 %s1416_s10, 4  ;;  %s2042_s26 = scalar_lea.hbm %s2607_s18, 2  ;;  %s2037_s0 = int_to_ptr.hbm [resolvable:$true] %s2036_s0 }
 0xbc5   : > { %s2038_s6 = scalar_lea.hbm %s2037_s0, 1  ;;  %p2043_p4 = scmp.lt.s32.totalorder %s2037_s0, %s2607_s18 }
 0xbc6   : > { %p2039_p1 = scmp.ne.s32.totalorder %s2037_s0, %s2038_s6  ;;  %p2044_p7 = scmp.lt.s32.totalorder %s2042_s26, %s2038_s6 }
 0xbc8   : > { %p2040_p2 = pnand %p2039_p1, %p2234_p5  ;;  %p2045_p8 = por %p2044_p7, %p2043_p4 }
 0xbca   : > { %p2041_p3 = pneg %p2040_p2 }
 0xbcc   : > { %p2046_p9 = pnand %p2045_p8, %p2041_p3 }
 0xbce   : > { %2049 = shalt.err (!%p2046_p9)
}
 0xbcf   : > { %1835 = dma.vmem_to_hbm [thread:$0]  (%p2234_p5), %s1414_s27, 16, %s1416_s10, %s1338_s5  }
 0xbd0 PF: > { %s2662_s7 = sld [smem:[#allocation13_spill]]  ;;  %p1857_p10 = scmp.ge.s32.totalorder %s2092_s30, 2 }
 0xbd2   : > { %p1842_p11 = pnand %p1857_p10, %p2238_p6 }
 0xbd4   : > { %p1843_p12 = pneg %p1842_p11 }
 0xbd6   : > { %s1427_s3 = sand.u32 1, %s2662_s7  }
 0xbd7   : > { %s1428_s1 = scalar_lea.sflag [#allocation3], %s1427_s3 }
 0xbd8   : > { %2067 = dma.done.wait (%p1843_p12), %s1428_s1, 128  }
 0xbd9   : > { %2069 = vsyncadd (%p1843_p12), %s1428_s1, 4294967168  ;;  %s2664_s28 = sadd.s32 4294967294, %s2092_s30  }
 0xbda   : > { %s1437_s2 = sand.u32 1, %s2664_s28  }
 0xbdb   : > { %s1438_s23 = scalar_lea.sflag [#allocation5], %s1437_s2 }
 0xbdc   : > { %2071 = dma.done.wait (%p1843_p12), %s1438_s23, 512  }
 0xbdd   : > { %2073 = vsyncadd (%p1843_p12), %s1438_s23, 4294966784  ;;  %s1458_s4 = scalar_lea.sflag [#allocation8], %s1437_s2 }
 0xbde   : > { %2075 = dma.done.wait (%p1843_p12), %s1458_s4, 32  }
 0xbdf   : > { %2077 = vsyncadd (%p1843_p12), %s1458_s4, 4294967264  ;;  %s2665_s30 = sld [smem:[#allocation16_spill]] }
 0xbe0   : > { %s2666_s27 = sld [smem:[#allocation14_spill]] }
 0xbe1   : > { %s2667_s28 = sld [smem:[#allocation15_spill]] }
 0xbe2   : > { %s2668_s29 = sld [smem:[#allocation17_spill]] }
 0xbe5   : > { %p35_p5 = scmp.ge.s32.totalorder %s2665_s30, 4  }
 0xbe7   :  { %37 = sbr.rel (!%p35_p5) target bundleno = 19 (0x13), region = 186 }
 0xbec   :  { %1472 = vsyncpa [#allocation3], 1 }
 0xbed   :  { %1474 = vsyncpa [#allocation3 + $0x1], 1 }
 0xbee   :  { %1475 = vsyncpa [#allocation5], 1 }
 0xbef   :  { %1477 = vsyncpa [#allocation5 + $0x1], 1 }
 0xbf0   :  { %1478 = vsyncpa [#allocation8], 1 }
 0xbf1   :  { %1480 = vsyncpa [#allocation8 + $0x1], 1 }

</bundles_post_ra>
